<compile_context>
chip_gen: v7x
topology: tpu7x:2x2x1
jax: 0.10.0
libtpu: 0.0.40
codegen_flags: <defaults>
</compile_context>

<pallas_src>
import functools

import jax
import jax.numpy as jnp
from jax.experimental import pallas as pl
from jax.experimental.pallas import tpu as pltpu


def _round_up(x, m):
    return ((x + m - 1) // m) * m


def _sigmoid(x):
    return 1.0 / (1.0 + jnp.exp(-x))


# --------------------------------------------------------------------------- #
# Kernel 1: K-tiled linear  y = x @ w_t + b   (MXU)
# --------------------------------------------------------------------------- #
def _linear_kernel(x_ref, w_ref, b_ref, o_ref, acc_ref):
    k = pl.program_id(1)

    @pl.when(k == 0)
    def _():
        acc_ref[...] = jnp.zeros_like(acc_ref)

    acc_ref[...] += jnp.dot(x_ref[...], w_ref[...],
                            preferred_element_type=jnp.float32)

    @pl.when(k == pl.num_programs(1) - 1)
    def _():
        o_ref[...] = (acc_ref[...] + b_ref[...]).astype(o_ref.dtype)


def linear_pallas(x, w_t, b=None, *, block_rows=512, block_k=1024):
    """x: (m, d_in), w_t: (d_in, d_out), b: (d_out,) or None -> (m, d_out)."""
    m_orig, d_in = x.shape
    d_out = w_t.shape[1]

    # Large, padded row tiles (perf feedback): pad ragged m instead of asserting.
    bm = min(block_rows, _round_up(m_orig, 8))
    m_pad = _round_up(m_orig, bm)
    if m_pad != m_orig:
        x = jnp.pad(x, ((0, m_pad - m_orig), (0, 0)))

    # K-tiling bounds the resident weight block (important once D grows on v7x).
    bk = min(block_k, d_in)
    if d_in % bk != 0:
        bk = d_in
    n_k = d_in // bk

    if b is None:
        b = jnp.zeros((d_out,), x.dtype)
    b2 = b.reshape(1, d_out).astype(jnp.float32)

    flops = 2 * m_pad * d_in * d_out
    bytes_accessed = 4 * (m_pad * d_in + d_in * d_out + d_out + m_pad * d_out)

    out = pl.pallas_call(
        _linear_kernel,
        out_shape=jax.ShapeDtypeStruct((m_pad, d_out), x.dtype),
        grid_spec=pltpu.PrefetchScalarGridSpec(
            num_scalar_prefetch=0,
            grid=(m_pad // bm, n_k),                      # reduction axis last
            in_specs=[
                pl.BlockSpec((bm, bk), lambda i, k: (i, k)),
                pl.BlockSpec((bk, d_out), lambda i, k: (k, 0)),
                pl.BlockSpec((1, d_out), lambda i, k: (0, 0)),
            ],
            out_specs=pl.BlockSpec((bm, d_out), lambda i, k: (i, 0)),
            scratch_shapes=[pltpu.VMEM((bm, d_out), jnp.float32)],
        ),
        compiler_params=pltpu.CompilerParams(
            dimension_semantics=("parallel", "arbitrary"),
            vmem_limit_bytes=40 * 1024 * 1024,            # below v7x's 64 MiB VMEM
        ),
        cost_estimate=pl.CostEstimate(flops=flops, transcendentals=0,
                                      bytes_accessed=bytes_accessed),
    )(x, w_t, b2)

    return out[:m_orig]


# --------------------------------------------------------------------------- #
# Kernel 2: one direction of the LSTM recurrence (grid over time, state in VMEM)
# --------------------------------------------------------------------------- #
def _lstm_step_kernel(xg_ref, whh_ref, len_ref, o_ref, h_scr, c_scr, *, reverse):
    t = pl.program_id(0)

    @pl.when(t == 0)
    def _():
        h_scr[...] = jnp.zeros_like(h_scr)
        c_scr[...] = jnp.zeros_like(c_scr)

    t_actual = (pl.num_programs(0) - 1 - t) if reverse else t

    hdim = h_scr.shape[-1]
    gates = xg_ref[0] + jnp.dot(h_scr[...], whh_ref[...],
                                preferred_element_type=jnp.float32)
    i_g = _sigmoid(gates[:, 0 * hdim:1 * hdim])   # PyTorch gate order: i, f, g, o
    f_g = _sigmoid(gates[:, 1 * hdim:2 * hdim])
    g_g = jnp.tanh(gates[:, 2 * hdim:3 * hdim])
    o_g = _sigmoid(gates[:, 3 * hdim:4 * hdim])

    c_new = f_g * c_scr[...] + i_g * g_g
    h_new = o_g * jnp.tanh(c_new)

    # packed-sequence semantics: rows past their length keep the zero initial
    # state and emit zeros (== pad_packed_sequence zero padding).
    valid = len_ref[...] > t_actual                      # (B, 1) bool
    h_new = jnp.where(valid, h_new, 0.0)
    c_new = jnp.where(valid, c_new, 0.0)

    h_scr[...] = h_new
    c_scr[...] = c_new
    o_ref[0, :, :] = h_new.astype(o_ref.dtype)


def lstm_direction_pallas(xgates, lengths, w_hh_t, *, reverse):
    """xgates: (T, B, 4H) time-major, w_hh_t: (H, 4H) -> h sequence (T, B, H)."""
    T, B, G = xgates.shape
    H = G // 4

    # Pad batch to a full 8-sublane tile; padded rows get length 0 -> all-zero.
    B_pad = _round_up(max(B, 8), 8)
    if B_pad != B:
        xgates = jnp.pad(xgates, ((0, 0), (0, B_pad - B), (0, 0)))
        lengths = jnp.pad(lengths, ((0, B_pad - B),))
    lengths2 = lengths.reshape(B_pad, 1).astype(jnp.int32)

    if reverse:
        time_map = lambda t: (T - 1 - t, 0, 0)
    else:
        time_map = lambda t: (t, 0, 0)

    kernel = functools.partial(_lstm_step_kernel, reverse=reverse)

    out = pl.pallas_call(
        kernel,
        out_shape=jax.ShapeDtypeStruct((T, B_pad, H), jnp.float32),
        grid_spec=pltpu.PrefetchScalarGridSpec(
            num_scalar_prefetch=0,
            grid=(T,),
            in_specs=[
                pl.BlockSpec((1, B_pad, G), time_map),
                pl.BlockSpec((H, G), lambda t: (0, 0)),
                pl.BlockSpec((B_pad, 1), lambda t: (0, 0)),
            ],
            out_specs=pl.BlockSpec((1, B_pad, H), time_map),
            scratch_shapes=[pltpu.VMEM((B_pad, H), jnp.float32),
                            pltpu.VMEM((B_pad, H), jnp.float32)],
        ),
        compiler_params=pltpu.CompilerParams(
            dimension_semantics=("arbitrary",),           # sequential h/c carry
            vmem_limit_bytes=40 * 1024 * 1024,
        ),
    )(xgates, w_hh_t, lengths2)

    return out[:, :B, :]


# --------------------------------------------------------------------------- #
# Full forward
# --------------------------------------------------------------------------- #
def frames_encoder_forward(frames, flengths, params, *, max_video_len=100):
    B, T_in, vid_dim = frames.shape
    E = params["w_in_t"].shape[1]
    H = params["w_hh_f_t"].shape[0]

    # self.linear (no bias). The sort/unsort around the LSTM cancels for the
    # returned outputs, so we keep original row order and mask by length instead.
    emb = linear_pallas(frames.reshape(B * T_in, vid_dim), params["w_in_t"])
    emb = emb.reshape(B, T_in, E)

    # Pre-compute the input-gate projections (biases folded in) on the MXU,
    # then run the sequential recurrence per direction.
    xg_f = linear_pallas(emb.reshape(B * T_in, E), params["w_ih_f_t"],
                         params["b_ih_f"] + params["b_hh_f"])
    xg_b = linear_pallas(emb.reshape(B * T_in, E), params["w_ih_b_t"],
                         params["b_ih_b"] + params["b_hh_b"])
    xg_f = jnp.transpose(xg_f.reshape(B, T_in, 4 * H), (1, 0, 2))   # (T, B, 4H)
    xg_b = jnp.transpose(xg_b.reshape(B, T_in, 4 * H), (1, 0, 2))

    h_f = lstm_direction_pallas(xg_f, flengths, params["w_hh_f_t"], reverse=False)
    h_b = lstm_direction_pallas(xg_b, flengths, params["w_hh_b_t"], reverse=True)

    out_bi = jnp.transpose(jnp.concatenate([h_f, h_b], axis=-1), (1, 0, 2))  # (B,T,2H)
    if max_video_len > T_in:   # pad_packed_sequence(total_length=max_video_len)
        out_bi = jnp.pad(out_bi, ((0, 0), (0, max_video_len - T_in), (0, 0)))

    # outputs_t: literal replication of the original module (unsorted outputs
    # indexed with descending-sorted lengths).
    sorted_len = jnp.sort(flengths)[::-1]
    outputs_t = out_bi[jnp.arange(B), sorted_len - 1, :]                     # (B, 2H)

    # self.video_linear1 (bias); applies to the zero-padded tail as well.
    out = linear_pallas(out_bi.reshape(B * max_video_len, 2 * H),
                        params["w1_t"], params["b1"])
    out = out.reshape(B, max_video_len, H)

    # TODO(synk): training-mode dropout is a no-op here (nn.LSTM dropout does
    # nothing with num_layers=1); video_linear2 is unused in forward.
    return out, outputs_t


# --------------------------------------------------------------------------- #
# Pure-JAX reference
# --------------------------------------------------------------------------- #
def reference_forward(frames, flengths, params, max_video_len=100):
    B, T, _ = frames.shape
    H = params["w_hh_f_t"].shape[0]
    hp = jax.lax.Precision.HIGHEST

    emb = jnp.einsum("btv,ve->bte", frames, params["w_in_t"], precision=hp)

    def run_dir(w_ih_t, w_hh_t, bias, reverse):
        xg = jnp.einsum("bte,eg->btg", emb, w_ih_t, precision=hp) + bias
        xg = jnp.transpose(xg, (1, 0, 2))                 # (T, B, 4H)
        ts = jnp.arange(T)
        if reverse:
            xg, ts = xg[::-1], ts[::-1]

        def step(carry, inp):
            h, c = carry
            x_t, t = inp
            gates = x_t + jnp.dot(h, w_hh_t, precision=hp)
            i = _sigmoid(gates[:, :H])
            f = _sigmoid(gates[:, H:2 * H])
            g = jnp.tanh(gates[:, 2 * H:3 * H])
            o = _sigmoid(gates[:, 3 * H:])
            c_n = f * c + i * g
            h_n = o * jnp.tanh(c_n)
            valid = (flengths > t)[:, None]
            h_n = jnp.where(valid, h_n, 0.0)
            c_n = jnp.where(valid, c_n, 0.0)
            return (h_n, c_n), h_n

        init = (jnp.zeros((B, H), jnp.float32), jnp.zeros((B, H), jnp.float32))
        _, hs = jax.lax.scan(step, init, (xg, ts))
        if reverse:
            hs = hs[::-1]
        return jnp.transpose(hs, (1, 0, 2))               # (B, T, H)

    h_f = run_dir(params["w_ih_f_t"], params["w_hh_f_t"],
                  params["b_ih_f"] + params["b_hh_f"], reverse=False)
    h_b = run_dir(params["w_ih_b_t"], params["w_hh_b_t"],
                  params["b_ih_b"] + params["b_hh_b"], reverse=True)
    out_bi = jnp.concatenate([h_f, h_b], axis=-1)
    if max_video_len > T:
        out_bi = jnp.pad(out_bi, ((0, 0), (0, max_video_len - T), (0, 0)))
    sorted_len = jnp.sort(flengths)[::-1]
    out_t = out_bi[jnp.arange(B), sorted_len - 1, :]
    out = jnp.einsum("btg,gh->bth", out_bi, params["w1_t"], precision=hp) + params["b1"]
    return out, out_t


if __name__ == "__main__":
    key = jax.random.PRNGKey(0)
    ks = jax.random.split(key, 12)

    # Module dims (hard-coded in FramesEncoder): vid_dim=2048, embed=hidden=512,
    # max_video_len=100; small batch / frame count for the demo.
    B, T_in = 2, 8
    VID, E, H, MAXLEN = 2048, 512, 512, 100

    def u(k, shape, bound):
        return jax.random.uniform(k, shape, minval=-bound, maxval=bound,
                                  dtype=jnp.float32)

    bw = 1.0 / (VID ** 0.5)
    bh = 1.0 / (H ** 0.5)
    b2 = 1.0 / ((2 * H) ** 0.5)
    params = {
        "w_in_t":   u(ks[0], (VID, E), bw),        # nn.Linear(2048, 512, bias=False)
        "w_ih_f_t": u(ks[1], (E, 4 * H), bh),      # LSTM forward direction
        "w_hh_f_t": u(ks[2], (H, 4 * H), bh),
        "b_ih_f":   u(ks[3], (4 * H,), bh),
        "b_hh_f":   u(ks[4], (4 * H,), bh),
        "w_ih_b_t": u(ks[5], (E, 4 * H), bh),      # LSTM reverse direction
        "w_hh_b_t": u(ks[6], (H, 4 * H), bh),
        "b_ih_b":   u(ks[7], (4 * H,), bh),
        "b_hh_b":   u(ks[8], (4 * H,), bh),
        "w1_t":     u(ks[9], (2 * H, H), b2),      # video_linear1
        "b1":       u(ks[10], (H,), b2),
    }
    frames = jax.random.normal(ks[11], (B, T_in, VID), dtype=jnp.float32)
    flengths = jnp.array([5, T_in], dtype=jnp.int32)   # variable lengths

    out, out_t = frames_encoder_forward(frames, flengths, params,
                                        max_video_len=MAXLEN)
    out = jax.block_until_ready(out)
    out_t = jax.block_until_ready(out_t)

    ref_out, ref_out_t = reference_forward(frames, flengths, params,
                                           max_video_len=MAXLEN)
    assert out.shape == (B, MAXLEN, H)
    assert out_t.shape == (B, 2 * H)
    assert jnp.allclose(out, ref_out, atol=5e-3, rtol=5e-3), "outputs mismatch"
    assert jnp.allclose(out_t, ref_out_t, atol=5e-3, rtol=5e-3), "outputs_t mismatch"

    print("KERNEL_OK")
</pallas_src>

<mosaic_0001>
module attributes {stable_mosaic.version = 11 : i64} {
  func.func @_linear_kernel(%arg0: i32, %arg1: i32, %arg2: memref<16x1024xf32, #tpu.memory_space<vmem>>, %arg3: memref<1024x512xf32, #tpu.memory_space<vmem>>, %arg4: memref<1x512xf32, #tpu.memory_space<vmem>>, %arg5: memref<16x512xf32, #tpu.memory_space<vmem>>, %arg6: memref<16x512xf32, #tpu.memory_space<vmem>>) attributes {dimension_semantics = [#tpu.dimension_semantics<parallel>, #tpu.dimension_semantics<arbitrary>], iteration_bounds = array<i64: 1, 2>, scalar_prefetch = 0 : i64, scratch_operands = 1 : i64, tpu.core_type = #tpu.core_type<tc>, window_params = [{transform_indices = @transform_0, window_bounds = array<i64: 16, 1024>}, {transform_indices = @transform_1, window_bounds = array<i64: 1024, 512>}, {pipeline_mode = #tpu.pipeline_mode<synchronous>, transform_indices = @transform_2, window_bounds = array<i64: 1, 512>}, {transform_indices = @transform_3, window_bounds = array<i64: 16, 512>}]} {
    %c0_i32 = arith.constant 0 : i32
    %0 = arith.cmpi eq, %arg1, %c0_i32 : i32
    %1 = arith.extui %0 : i1 to i32
    %c0_i32_0 = arith.constant 0 : i32
    %2 = arith.cmpi ne, %1, %c0_i32_0 : i32
    scf.if %2 {
      %cst_9 = arith.constant 0.000000e+00 : f32
      %12 = vector.broadcast %cst_9 : f32 to vector<16x512xf32>
      %c0_10 = arith.constant 0 : index
      %c0_11 = arith.constant 0 : index
      %13 = vector.load %arg6[%c0_10, %c0_11] : memref<16x512xf32, #tpu.memory_space<vmem>>, vector<16x512xf32>
      tpu.vector_store %arg6[%c0_10, %c0_11], %12 {strides = array<i32>} : memref<16x512xf32, #tpu.memory_space<vmem>>, vector<16x512xf32>,
    } else {
    }
    %c0 = arith.constant 0 : index
    %c0_1 = arith.constant 0 : index
    %3 = vector.load %arg6[%c0, %c0_1] : memref<16x512xf32, #tpu.memory_space<vmem>>, vector<16x512xf32>
    %c0_2 = arith.constant 0 : index
    %c0_3 = arith.constant 0 : index
    %4 = vector.load %arg2[%c0_2, %c0_3] : memref<16x1024xf32, #tpu.memory_space<vmem>>, vector<16x1024xf32>
    %c0_4 = arith.constant 0 : index
    %c0_5 = arith.constant 0 : index
    %5 = vector.load %arg3[%c0_4, %c0_5] : memref<1024x512xf32, #tpu.memory_space<vmem>>, vector<1024x512xf32>
    %cst = arith.constant dense<0.000000e+00> : vector<16x512xf32>
    %6 = tpu.matmul %4, %5, %cst {dimension_numbers = #tpu.dot_dimension_numbers<[1], [0], [0], [1], [0, 0, 1, 1], [], []>} : vector<16x1024xf32>, vector<1024x512xf32>, vector<16x512xf32> -> vector<16x512xf32>
    %7 = arith.addf %3, %6 : vector<16x512xf32>
    %c0_6 = arith.constant 0 : index
    %c0_7 = arith.constant 0 : index
    %8 = vector.load %arg6[%c0_6, %c0_7] : memref<16x512xf32, #tpu.memory_space<vmem>>, vector<16x512xf32>
    tpu.vector_store %arg6[%c0_6, %c0_7], %7 {strides = array<i32>} : memref<16x512xf32, #tpu.memory_space<vmem>>, vector<16x512xf32>,
    %c1_i32 = arith.constant 1 : i32
    %9 = arith.cmpi eq, %arg1, %c1_i32 : i32
    %10 = arith.extui %9 : i1 to i32
    %c0_i32_8 = arith.constant 0 : i32
    %11 = arith.cmpi ne, %10, %c0_i32_8 : i32
    scf.if %11 {
      %c0_9 = arith.constant 0 : index
      %c0_10 = arith.constant 0 : index
      %12 = vector.load %arg6[%c0_9, %c0_10] : memref<16x512xf32, #tpu.memory_space<vmem>>, vector<16x512xf32>
      %c0_11 = arith.constant 0 : index
      %c0_12 = arith.constant 0 : index
      %13 = vector.load %arg4[%c0_11, %c0_12] : memref<1x512xf32, #tpu.memory_space<vmem>>, vector<1x512xf32>
      %14 = vector.broadcast %13 : vector<1x512xf32> to vector<16x512xf32>
      %15 = arith.addf %12, %14 : vector<16x512xf32>
      %c0_13 = arith.constant 0 : index
      %c0_14 = arith.constant 0 : index
      %16 = vector.load %arg5[%c0_13, %c0_14] : memref<16x512xf32, #tpu.memory_space<vmem>>, vector<16x512xf32>
      tpu.vector_store %arg5[%c0_13, %c0_14], %15 {strides = array<i32>} : memref<16x512xf32, #tpu.memory_space<vmem>>, vector<16x512xf32>,
    } else {
    }
    return
  }
  func.func @transform_0(%arg0: i32, %arg1: i32) -> (i32, i32) {
    %c0_i32 = arith.constant 0 : i32
    return %arg0, %arg1 : i32, i32
  }
  func.func @transform_1(%arg0: i32, %arg1: i32) -> (i32, i32) {
    %c0_i32 = arith.constant 0 : i32
    %c0_i32_0 = arith.constant 0 : i32
    return %arg1, %c0_i32 : i32, i32
  }
  func.func @transform_2(%arg0: i32, %arg1: i32) -> (i32, i32) {
    %c0_i32 = arith.constant 0 : i32
    %c0_i32_0 = arith.constant 0 : i32
    %c0_i32_1 = arith.constant 0 : i32
    return %c0_i32, %c0_i32_0 : i32, i32
  }
  func.func @transform_3(%arg0: i32, %arg1: i32) -> (i32, i32) {
    %c0_i32 = arith.constant 0 : i32
    %c0_i32_0 = arith.constant 0 : i32
    return %arg0, %c0_i32 : i32, i32
  }
}

</mosaic_0001>

<bundles_post_ra>
// kernel: tpu_custom_call.1
= control target key start
LH: loop header
LB: loop body
LE: loop exit
PB: predicated region body
PF: predicated region fallthrough
CT: control target
= control target key end

     0   :  { %s3208_s0 = inlined_call_operand.hbm [shape: f32[16,2048], index: 0, kind: input, shape index: {}]   ;;  %s3209_s1 = inlined_call_operand.hbm [shape: f32[2048,512], index: 1, kind: input, shape index: {}]   ;;  %s3210_s2 = inlined_call_operand.hbm [shape: f32[1,512], index: 2, kind: input, shape index: {}]   ;;  %s3211_s3 = inlined_call_operand.hbm [shape: f32[16,512], index: 3, kind: output, shape index: {}]  }
   0x1   :  { %3216 = sst [smem:[#allocation14_spill]] %s3208_s0 }
   0x2   :  { %8 = vsyncpa [#allocation4], 0 }
   0x3   :  { %10 = vsyncpa [#allocation4 + $0x1], 0 }
   0x4   :  { %11 = vsyncpa [#allocation7], 0 }
   0x5   :  { %13 = vsyncpa [#allocation7 + $0x1], 0 }
   0x6   :  { %14 = vsyncpa [#allocation5], 0  ;;  %s2451_s12 = smov 0   ;;  %s2453_s13 = smov 0  }
   0x7   :  { %s2455_s14 = smov 0   ;;  %s2457_s15 = smov 0  }
   0x8   :  { %s2459_s16 = smov 0   ;;  %s2461_s17 = smov 0  }
   0x9 LB: > { %s2480_s18 = sadd.s32 4294967295, %s2417_s17   ;;  %s41_s19 = sadd.s32 1, %s2405_s14  ;;  %s2417_s17 = sphi %s2461_s17, %s20_s17   ;;  %s2413_s16 = sphi %s2459_s16, %s3231_s16   ;;  %s2409_s15 = sphi %s2457_s15, %s3230_s15   ;;  %s2405_s14 = sphi %s2455_s14, %s3229_s14   ;;  %s2401_s13 = sphi %s2453_s13, %s3228_s13   ;;  %s2397_s12 = sphi %s2451_s12, %s3227_s12  }
   0xa   : > { %p48_p0 = scmp.ne.s32.totalorder %s2405_s14, %s2401_s13  ;;  %p49_p1 = scmp.eq.s32.totalorder %s2417_s17, 0 }
   0xb   : > { %p54_p2 = scmp.ne.s32.totalorder %s2401_s13, %s2397_s12  ;;  %p3212_p3 = scmp.eq.s32.totalorder %s2480_s18, 0 }
   0xc   : > { %p50_p4 = por %p49_p1, %p48_p0  ;;  %p1596_p5 = scmp.ge.s32.totalorder %s2417_s17, 1 }
   0xd   : > { %p2491_p6 = por %p3212_p3, %p54_p2  ;;  %p138_p7 = scmp.lt.s32.totalorder %s2417_s17, 3 }
   0xe   : > { %s2419_s22 = smov [#allocation8]   ;;  %p2179_p10 = scmp.lt.s32.totalorder %s2417_s17, 2 }
   0xf   : > { %s3217_s20 = scalar_select %p2491_p6, 1, 0 }
  0x10   : > { %p2496_p8 = pnand %p1596_p5, %p138_p7  ;;  %s151_s23 = sshll.u32 %s2419_s22, 4  ;;  %s152_s23 = int_to_ptr.vmem [resolvable:$true] %s151_s23 }
  0x11   : > { %s2504_s24 = sand.u32 1, %s2405_s14   ;;  %p2512_p12 = pnand %p2179_p10, %p50_p4 }
  0x12   : > { %s3218_s21 = scalar_select %p2496_p8, 1, 0 }
  0x13   : > { %p2167_p9 = pneg %p2496_p8  ;;  %s2241_s29 = scalar_lea.hbm %s3210_s2, 64 }
  0x14   : > { %s3220_s26 = scalar_select %p2512_p12, 1, 0 }
  0x15   : > { %p2508_p11 = pnand %p2167_p9, %p3212_p3  ;;  %p2242_p13 = scmp.ne.s32.totalorder %s3210_s2, %s2241_s29 }
  0x16   : > { %p2248_p5 = scmp.lt.u32.totalorder %s2241_s29, %s3210_s2 }
  0x17   : > { %p2243_p0 = pneg %p2508_p11 }
  0x19   : > { %p2244_p1 = pnand %p2243_p0, %p2242_p13 }
  0x1b   : > { %p2245_p2 = pneg %p2244_p1 }
  0x1d   : > { %p2250_p4 = pnand %p2248_p5, %p2245_p2 }
  0x1f   : > { %2253 = shalt.err (!%p2250_p4)
}
  0x20   : > { %s2254_s7 = scalar_lea.vmem %s152_s23, 64  ;;  %p2262_p3 = scmp.lt.s32.totalorder %s152_s23, %s152_s23 }
  0x21   : > { %p2255_p7 = scmp.ne.s32.totalorder %s152_s23, %s2254_s7  ;;  %p2263_p6 = scmp.lt.s32.totalorder %s2254_s7, %s2254_s7 }
  0x23   : > { %p2257_p9 = pnand %p2255_p7, %p2243_p0  ;;  %p2264_p8 = por %p2263_p6, %p2262_p3 }
  0x25   : > { %p2258_p10 = pneg %p2257_p9 }
  0x27   : > { %p2265_p12 = pnand %p2264_p8, %p2258_p10 }
  0x29   : > { %2268 = shalt.err (!%p2265_p12)
}
  0x2a   : > { %2170 = dma.hbm_to_vmem [thread:$0]  (!%p2508_p11), %s3210_s2, 64, %s152_s23, [#allocation7]  }
  0x2b   : > { %s29_s10 = sadd.s32 1, %s2413_s16  ;;  %s1599_s11 = sshll.u32 %s2504_s24, 7 }
  0x2c   : > { %p30_p3 = scmp.ge.s32.totalorder %s29_s10, 2  ;;  %s1616_s12 = sshll.u32 %s2413_s16, 10 }
  0x2d   : > { %s166_s22 = scalar_lea.vmem [#allocation3], %s1599_s11  ;;  %s3221_s0 = sld [smem:[#allocation14_spill]] }
  0x2e   : > { %s176_s25 = sshll.u32 %s166_s22, 4  ;;  %s3233_s10 = smov (%p30_p3, %s29_s10), 0  ;;  %s2542_s25 = int_to_ptr.vmem [resolvable:$true] %s176_s25 }
  0x2f   : > { %s37_s23 = ssub.s32 %s2413_s16, %s3233_s10  ;;  %s186_s30 = sand.u32 1, %s2417_s17  }
  0x30   : > { %p39_p6 = scmp.eq.s32.totalorder %s37_s23, 0  ;;  %s163_s5 = scalar_lea.sflag [#allocation4], %s2504_s24 }
  0x31   : > { %p3222_p11 = scmp.ne.s32.totalorder %s3220_s26, 0 }
  0x32   : > { %s2550_s4 = scalar_select %p39_p6, %s2405_s14, %s41_s19  }
  0x33   : > { %s2540_s29 = scalar_lea.hbm %s3221_s0, %s1616_s12  ;;  %p2271_p12 = pneg %p3222_p11 }
  0x34   : > { %s2269_s6 = scalar_lea.hbm %s2540_s29, 2048  ;;  %s2274_s9 = scalar_lea.hbm %s3221_s0, 4096 }
  0x35   : > { %p2270_p8 = scmp.ne.s32.totalorder %s2540_s29, %s2269_s6  ;;  %p2275_p1 = scmp.lt.u32.totalorder %s2540_s29, %s3221_s0 }
  0x36   : > { %p2276_p2 = scmp.lt.u32.totalorder %s2274_s9, %s2269_s6  ;;  %p2278_p4 = scmp.lt.u32.totalorder %s2269_s6, %s2540_s29 }
  0x37   : > { %p2272_p13 = pnand %p2271_p12, %p2270_p8 }
  0x38   : > { %p2277_p5 = por %p2276_p2, %p2275_p1 }
  0x39   : > { %p2273_p0 = pneg %p2272_p13 }
  0x3a   : > { %p2279_p7 = por %p2278_p4, %p2277_p5 }
  0x3c   : > { %p2280_p9 = pnand %p2279_p7, %p2273_p0 }
  0x3e   : > { %2283 = shalt.err (!%p2280_p9)
}
  0x3f   : > { %s2284_s19 = scalar_lea.vmem %s2542_s25, 2048  ;;  %s2420_s22 = smov [#allocation3]  }
  0x40   : > { %p2285_p10 = scmp.ne.s32.totalorder %s2542_s25, %s2284_s19  ;;  %s2289_s27 = sshll.u32 %s2420_s22, 4  ;;  %s2290_s27 = int_to_ptr.vmem [resolvable:$false] %s2289_s27 }
  0x41   : > { %s2291_s28 = scalar_lea.vmem %s2290_s27, 4096  ;;  %p2292_p8 = scmp.lt.s32.totalorder %s2542_s25, %s2290_s27 }
  0x42   : > { %p2287_p3 = pnand %p2285_p10, %p2271_p12  ;;  %p2293_p13 = scmp.lt.s32.totalorder %s2291_s28, %s2284_s19 }
  0x44   : > { %p2288_p6 = pneg %p2287_p3  ;;  %p2294_p1 = por %p2293_p13, %p2292_p8 }
  0x46   : > { %p2295_p2 = pnand %p2294_p1, %p2288_p6 }
  0x48   : > { %2298 = shalt.err (!%p2295_p2)
}
  0x49   : > { %s2421_s23 = smov 2048   ;;  %s2422_s6 = smov 1024  }
  0x4a   : > { %s2423_s7 = smov 64   ;;  %s1602_s8 = sshll.u32 %s2504_s24, 12 }
  0x4b   : > { %2174 = dma.hbm_to_vmem [thread:$0]  (!%p3222_p11), %s2540_s29, 2048, %s2542_s25, %s163_s5, %s2421_s23, %s2422_s6, %s2423_s7  }
  0x4c   : > { %s1618_s9 = sshll.u32 %s2413_s16, 16  ;;  %s190_s22 = scalar_lea.vmem [#allocation6], %s1602_s8 }
  0x4d   : > { %s2585_s19 = scalar_lea.hbm %s3209_s1, %s1618_s9  ;;  %s198_s27 = sshll.u32 %s190_s22, 4  ;;  %s2587_s27 = int_to_ptr.vmem [resolvable:$true] %s198_s27 }
  0x4e   : > { %s2591_s28 = scalar_lea.sflag [#allocation7], %s186_s30  ;;  %s2299_s0 = scalar_lea.hbm %s2585_s19, 65536 }
  0x4f   : > { %p2300_p0 = scmp.ne.s32.totalorder %s2585_s19, %s2299_s0  ;;  %s2304_s29 = scalar_lea.hbm %s3209_s1, 131072 }
  0x50   : > { %p2305_p7 = scmp.lt.u32.totalorder %s2585_s19, %s3209_s1  ;;  %p2306_p9 = scmp.lt.u32.totalorder %s2304_s29, %s2299_s0 }
  0x51   : > { %p2302_p5 = pnand %p2300_p0, %p2271_p12  ;;  %p2308_p3 = scmp.lt.u32.totalorder %s2299_s0, %s2585_s19 }
  0x52   : > { %p2307_p10 = por %p2306_p9, %p2305_p7 }
  0x53   : > { %p2303_p4 = pneg %p2302_p5 }
  0x54   : > { %p2309_p6 = por %p2308_p3, %p2307_p10 }
  0x56   : > { %p2310_p8 = pnand %p2309_p6, %p2303_p4 }
  0x58   : > { %2313 = shalt.err (!%p2310_p8)
}
  0x59   : > { %s2314_s30 = scalar_lea.vmem %s2587_s27, 65536  ;;  %s2424_s6 = smov [#allocation6]  }
  0x5a   : > { %p2315_p13 = scmp.ne.s32.totalorder %s2587_s27, %s2314_s30  ;;  %s2319_s7 = sshll.u32 %s2424_s6, 4  ;;  %s2320_s7 = int_to_ptr.vmem [resolvable:$false] %s2319_s7 }
  0x5b   : > { %s2321_s8 = scalar_lea.vmem %s2320_s7, 131072  ;;  %p2322_p0 = scmp.lt.s32.totalorder %s2587_s27, %s2320_s7 }
  0x5c   : > { %p2317_p1 = pnand %p2315_p13, %p2271_p12  ;;  %p2323_p5 = scmp.lt.s32.totalorder %s2321_s8, %s2314_s30 }
  0x5e   : > { %p2318_p2 = pneg %p2317_p1  ;;  %p2324_p7 = por %p2323_p5, %p2322_p0 }
  0x60   : > { %p2325_p9 = pnand %p2324_p7, %p2318_p2 }
  0x62   : > { %2328 = shalt.err (!%p2325_p9)
}
  0x63   : > { %s2425_s0 = smov 512   ;;  %s2426_s9 = smov 32  }
  0x64   : > { %2177 = dma.hbm_to_vmem [thread:$0]  (!%p3222_p11), %s2585_s19, 65536, %s2587_s27, %s2591_s28, %s2425_s0, %s2425_s0, %s2426_s9  }
  0x65   : > { %p3223_p12 = scmp.ne.s32.totalorder %s3218_s21, 0 }
  0x66   : > { %s212_s11 = sand.u32 (!%p3223_p12), 1, %s2401_s13   ;;  %p3224_p4 = scmp.ne.s32.totalorder (!%p3223_p12), %s3217_s20, 0 }
  0x67   : > { %210 = sbr.rel (%p3223_p12) target bundleno = 643 (0x283), region = 32  ;;  %s1607_s12 = sshll.u32 (!%p3223_p12), %s212_s11, 7 }
  0x68   : > { %s213_s22 = scalar_lea.sflag (!%p3223_p12), [#allocation4], %s212_s11  ;;  %s2620_s24 = scalar_lea.vmem (!%p3223_p12), [#allocation3], %s1607_s12 }
  0x6e   : > { %2380 = dma.done.wait (%p3224_p4), %s213_s22, 2048  }
  0x6f   : > { %2382 = vsyncadd (%p3224_p4), %s213_s22, 4294965248  ;;  %s221_s25 = sand.u32 1, %s2480_s18   ;;  %s1608_s26 = sshll.u32 %s212_s11, 12 }
  0x70   : > { %s222_s19 = scalar_lea.sflag [#allocation7], %s221_s25  ;;  %s2627_s27 = scalar_lea.vmem [#allocation6], %s1608_s26 }
  0x71   : > { %2384 = dma.done.wait (%p3224_p4), %s222_s19, 65536  }
  0x72   : > { %2386 = vsyncadd (%p3224_p4), %s222_s19, 4294901760  ;;  %p3225_p11 = scmp.eq.s32.totalorder %s2480_s18, 0 }
  0x74   : > { %2388 = dma.done.wait (%p3225_p11), [#allocation7], 64   ;;  %p3226_p10 = pmov %p3225_p11 }
  0x75   : > { %p1610_p3 = scmp.ne.s32.totalorder %s2409_s15, 0 }
  0x76   : > { %2390 = vsyncadd (%p3226_p10), [#allocation7], 4294967232  ;;  %v2427_v0 = vmov (!%p1610_p3), 0.0  }
  0x77   : > { %259 = sbr.rel (%p1610_p3) target bundleno = 126 (0x7e), region = 48  ;;  %260 = vst [vmem:[#allocation2] sm:$0xff] (!%p1610_p3), %v2427_v0  ;;  %261 = vst [vmem:[#allocation2 + $0x8] sm:$0xff] (!%p1610_p3), %v2427_v0 }
  0x78   : > { %262 = vst [vmem:[#allocation2 + $0x10] sm:$0xff] (!%p1610_p3), %v2427_v0  ;;  %263 = vst [vmem:[#allocation2 + $0x18] sm:$0xff] (!%p1610_p3), %v2427_v0 }
  0x79   : > { %264 = vst [vmem:[#allocation2 + $0x20] sm:$0xff] (!%p1610_p3), %v2427_v0  ;;  %265 = vst [vmem:[#allocation2 + $0x28] sm:$0xff] (!%p1610_p3), %v2427_v0 }
  0x7a   : > { %266 = vst [vmem:[#allocation2 + $0x30] sm:$0xff] (!%p1610_p3), %v2427_v0  ;;  %267 = vst [vmem:[#allocation2 + $0x38] sm:$0xff] (!%p1610_p3), %v2427_v0 }
  0x7e PF: > { %v293_v1 = vld [vmem:[%s2627_s27 + $0x8] sm:$0xff]  ;;  %v295_v3 = vld [vmem:[%s2627_s27 + $0x18] sm:$0xff]  ;;  %v292_v6 = vld [vmem:[%s2627_s27] sm:$0xff]  ;;  %p1611_p6 = scmp.ne.s32.totalorder %s2409_s15, 1 }
  0x7f   : > { %v297_v2 = vld [vmem:[%s2627_s27 + $0x28] sm:$0xff]  ;;  %v299_v5 = vld [vmem:[%s2627_s27 + $0x38] sm:$0xff]  ;;  %v296_v7 = vld [vmem:[%s2627_s27 + $0x20] sm:$0xff] }
  0x80   : > { %v1619_v4 = vpack.c.bf16 %v297_v2, %v293_v1  ;;  %v1875_v8 = vpack.c.bf16 %v299_v5, %v295_v3  ;;  %v1621_v9 = vpack.c.bf16 %v296_v7, %v292_v6  ;;  %v294_v10 = vld [vmem:[%s2627_s27 + $0x10] sm:$0xff]  ;;  %v301_v12 = vld [vmem:[%s2627_s27 + $0x48] sm:$0xff]  ;;  %v303_v15 = vld [vmem:[%s2627_s27 + $0x58] sm:$0xff] }
  0x81   : > { %v298_v11 = vld [vmem:[%s2627_s27 + $0x30] sm:$0xff]  ;;  %v305_v14 = vld [vmem:[%s2627_s27 + $0x68] sm:$0xff]  ;;  %v307_v16 = vld [vmem:[%s2627_s27 + $0x78] sm:$0xff] }
  0x82   : > { %1620 = vmatprep.subr.bf16.mxu0 %v1619_v4  ;;  %v1877_v13 = vpack.c.bf16 %v298_v11, %v294_v10  ;;  %1876 = vmatprep.subr.bf16.mxu1 %v1875_v8  ;;  %v1623_v17 = vpack.c.bf16 %v305_v14, %v301_v12  ;;  %v1879_v18 = vpack.c.bf16 %v307_v16, %v303_v15  ;;  %v300_v19 = vld [vmem:[%s2627_s27 + $0x40] sm:$0xff]  ;;  %v302_v21 = vld [vmem:[%s2627_s27 + $0x50] sm:$0xff]  ;;  %v309_v24 = vld [vmem:[%s2627_s27 + $0x88] sm:$0xff] }
  0x83   : > { %1622 = vmatpush1.bf16.msra.mxu0 %v1621_v9  ;;  %v304_v20 = vld [vmem:[%s2627_s27 + $0x60] sm:$0xff]  ;;  %v306_v23 = vld [vmem:[%s2627_s27 + $0x70] sm:$0xff]  ;;  %v313_v25 = vld [vmem:[%s2627_s27 + $0xa8] sm:$0xff] }
  0x84   : > { %1878 = vmatpush1.bf16.msra.mxu1 %v1877_v13  ;;  %v1625_v22 = vpack.c.bf16 %v304_v20, %v300_v19  ;;  %1624 = vmatprep.subr.bf16.mxu0 %v1623_v17  ;;  %v1881_v26 = vpack.c.bf16 %v306_v23, %v302_v21  ;;  %v1627_v27 = vpack.c.bf16 %v313_v25, %v309_v24  ;;  %v311_v28 = vld [vmem:[%s2627_s27 + $0x98] sm:$0xff]  ;;  %v308_v30 = vld [vmem:[%s2627_s27 + $0x80] sm:$0xff]  ;;  %v310_v33 = vld [vmem:[%s2627_s27 + $0x90] sm:$0xff] }
  0x85   : > { %1880 = vmatprep.subr.bf16.mxu1 %v1879_v18  ;;  %v315_v29 = vld [vmem:[%s2627_s27 + $0xb8] sm:$0xff]  ;;  %v312_v32 = vld [vmem:[%s2627_s27 + $0xa0] sm:$0xff]  ;;  %v314_v34 = vld [vmem:[%s2627_s27 + $0xb0] sm:$0xff] }
  0x86   : > { %v1883_v31 = vpack.c.bf16 %v315_v29, %v311_v28  ;;  %v1629_v35 = vpack.c.bf16 %v312_v32, %v308_v30  ;;  %v317_v36 = vld [vmem:[%s2627_s27 + $0xc8] sm:$0xff]  ;;  %v319_v38 = vld [vmem:[%s2627_s27 + $0xd8] sm:$0xff]  ;;  %v1885_v39 = vpack.c.bf16 %v314_v34, %v310_v33  ;;  %v316_v42 = vld [vmem:[%s2627_s27 + $0xc0] sm:$0xff] }
  0x87   : > { %1626 = vmatpush1.bf16.msra.mxu0 %v1625_v22  ;;  %v321_v37 = vld [vmem:[%s2627_s27 + $0xe8] sm:$0xff]  ;;  %v323_v41 = vld [vmem:[%s2627_s27 + $0xf8] sm:$0xff]  ;;  %v320_v43 = vld [vmem:[%s2627_s27 + $0xe0] sm:$0xff] }
  0x88   : > { %1882 = vmatpush1.bf16.msra.mxu1 %v1881_v26  ;;  %1628 = vmatprep.subr.bf16.mxu0 %v1627_v27  ;;  %v1631_v40 = vpack.c.bf16 %v321_v37, %v317_v36  ;;  %v1887_v44 = vpack.c.bf16 %v323_v41, %v319_v38  ;;  %v318_v45 = vld [vmem:[%s2627_s27 + $0xd0] sm:$0xff]  ;;  %v325_v47 = vld [vmem:[%s2627_s27 + $0x108] sm:$0xff]  ;;  %v327_v49 = vld [vmem:[%s2627_s27 + $0x118] sm:$0xff]  ;;  %v1633_v51 = vpack.c.bf16 %v320_v43, %v316_v42 }
  0x89   : > { %1884 = vmatprep.subr.bf16.mxu1 %v1883_v31  ;;  %v322_v46 = vld [vmem:[%s2627_s27 + $0xf0] sm:$0xff]  ;;  %v329_v48 = vld [vmem:[%s2627_s27 + $0x128] sm:$0xff]  ;;  %v331_v50 = vld [vmem:[%s2627_s27 + $0x138] sm:$0xff] }
  0x8a   : > { %v1889_v52 = vpack.c.bf16 %v322_v46, %v318_v45  ;;  %v1635_v53 = vpack.c.bf16 %v329_v48, %v325_v47  ;;  %v324_v54 = vld [vmem:[%s2627_s27 + $0x100] sm:$0xff]  ;;  %v326_v56 = vld [vmem:[%s2627_s27 + $0x110] sm:$0xff]  ;;  %v1891_v57 = vpack.c.bf16 %v331_v50, %v327_v49  ;;  %v333_v59 = vld [vmem:[%s2627_s27 + $0x148] sm:$0xff] }
  0x8b   : > { %1630 = vmatpush1.bf16.msra.mxu0 %v1629_v35  ;;  %v328_v55 = vld [vmem:[%s2627_s27 + $0x120] sm:$0xff]  ;;  %v330_v58 = vld [vmem:[%s2627_s27 + $0x130] sm:$0xff]  ;;  %v337_v60 = vld [vmem:[%s2627_s27 + $0x168] sm:$0xff] }
  0x8c   : > { %1886 = vmatpush1.bf16.msra.mxu1 %v1885_v39  ;;  %1632 = vmatprep.subr.bf16.mxu0 %v1631_v40  ;;  %v335_v61 = vld [vmem:[%s2627_s27 + $0x158] sm:$0xff]  ;;  %v1637_v63 = vpack.c.bf16 %v328_v55, %v324_v54  ;;  %v1893_v0 = vpack.c.bf16 %v330_v58, %v326_v56  ;;  %v1639_v1 = vpack.c.bf16 %v337_v60, %v333_v59  ;;  %v332_v2 = vld [vmem:[%s2627_s27 + $0x140] sm:$0xff]  ;;  %v334_v4 = vld [vmem:[%s2627_s27 + $0x150] sm:$0xff] }
  0x8d   : > { %1888 = vmatprep.subr.bf16.mxu1 %v1887_v44  ;;  %v339_v62 = vld [vmem:[%s2627_s27 + $0x178] sm:$0xff]  ;;  %v336_v3 = vld [vmem:[%s2627_s27 + $0x160] sm:$0xff]  ;;  %v338_v6 = vld [vmem:[%s2627_s27 + $0x170] sm:$0xff] }
  0x8e   : > { %v1895_v5 = vpack.c.bf16 %v339_v62, %v335_v61  ;;  %v341_v7 = vld [vmem:[%s2627_s27 + $0x188] sm:$0xff]  ;;  %v343_v9 = vld [vmem:[%s2627_s27 + $0x198] sm:$0xff]  ;;  %v1641_v11 = vpack.c.bf16 %v336_v3, %v332_v2  ;;  %v1897_v12 = vpack.c.bf16 %v338_v6, %v334_v4  ;;  %v340_v14 = vld [vmem:[%s2627_s27 + $0x180] sm:$0xff] }
  0x8f   : > { %1634 = vmatpush1.bf16.msra.mxu0 %v1633_v51  ;;  %v345_v8 = vld [vmem:[%s2627_s27 + $0x1a8] sm:$0xff]  ;;  %v347_v10 = vld [vmem:[%s2627_s27 + $0x1b8] sm:$0xff]  ;;  %v344_v15 = vld [vmem:[%s2627_s27 + $0x1a0] sm:$0xff] }
  0x90   : > { %1890 = vmatpush1.bf16.msra.mxu1 %v1889_v52  ;;  %1636 = vmatprep.subr.bf16.mxu0 %v1635_v53  ;;  %v1643_v13 = vpack.c.bf16 %v345_v8, %v341_v7  ;;  %v342_v16 = vld [vmem:[%s2627_s27 + $0x190] sm:$0xff]  ;;  %v1899_v17 = vpack.c.bf16 %v347_v10, %v343_v9  ;;  %v349_v19 = vld [vmem:[%s2627_s27 + $0x1c8] sm:$0xff]  ;;  %v351_v21 = vld [vmem:[%s2627_s27 + $0x1d8] sm:$0xff]  ;;  %v1645_v23 = vpack.c.bf16 %v344_v15, %v340_v14 }
  0x91   : > { %1892 = vmatprep.subr.bf16.mxu1 %v1891_v57  ;;  %v346_v18 = vld [vmem:[%s2627_s27 + $0x1b0] sm:$0xff]  ;;  %v353_v20 = vld [vmem:[%s2627_s27 + $0x1e8] sm:$0xff]  ;;  %v355_v22 = vld [vmem:[%s2627_s27 + $0x1f8] sm:$0xff] }
  0x92   : > { %v1901_v24 = vpack.c.bf16 %v346_v18, %v342_v16  ;;  %v1647_v25 = vpack.c.bf16 %v353_v20, %v349_v19  ;;  %v348_v26 = vld [vmem:[%s2627_s27 + $0x1c0] sm:$0xff]  ;;  %v350_v28 = vld [vmem:[%s2627_s27 + $0x1d0] sm:$0xff]  ;;  %v1903_v29 = vpack.c.bf16 %v355_v22, %v351_v21  ;;  %v357_v31 = vld [vmem:[%s2627_s27 + $0x208] sm:$0xff] }
  0x93   : > { %1638 = vmatpush1.bf16.msra.mxu0 %v1637_v63  ;;  %v352_v27 = vld [vmem:[%s2627_s27 + $0x1e0] sm:$0xff]  ;;  %v354_v30 = vld [vmem:[%s2627_s27 + $0x1f0] sm:$0xff]  ;;  %v361_v32 = vld [vmem:[%s2627_s27 + $0x228] sm:$0xff] }
  0x94   : > { %1894 = vmatpush1.bf16.msra.mxu1 %v1893_v0  ;;  %1640 = vmatprep.subr.bf16.mxu0 %v1639_v1  ;;  %v359_v33 = vld [vmem:[%s2627_s27 + $0x218] sm:$0xff]  ;;  %v1649_v35 = vpack.c.bf16 %v352_v27, %v348_v26  ;;  %v1905_v36 = vpack.c.bf16 %v354_v30, %v350_v28  ;;  %v1651_v37 = vpack.c.bf16 %v361_v32, %v357_v31  ;;  %v356_v38 = vld [vmem:[%s2627_s27 + $0x200] sm:$0xff]  ;;  %v358_v40 = vld [vmem:[%s2627_s27 + $0x210] sm:$0xff] }
  0x95   : > { %1896 = vmatprep.subr.bf16.mxu1 %v1895_v5  ;;  %v363_v34 = vld [vmem:[%s2627_s27 + $0x238] sm:$0xff]  ;;  %v360_v39 = vld [vmem:[%s2627_s27 + $0x220] sm:$0xff]  ;;  %v362_v42 = vld [vmem:[%s2627_s27 + $0x230] sm:$0xff] }
  0x96   : > { %v1907_v41 = vpack.c.bf16 %v363_v34, %v359_v33  ;;  %v365_v43 = vld [vmem:[%s2627_s27 + $0x248] sm:$0xff]  ;;  %v367_v45 = vld [vmem:[%s2627_s27 + $0x258] sm:$0xff]  ;;  %v1653_v47 = vpack.c.bf16 %v360_v39, %v356_v38  ;;  %v1909_v48 = vpack.c.bf16 %v362_v42, %v358_v40  ;;  %v364_v50 = vld [vmem:[%s2627_s27 + $0x240] sm:$0xff] }
  0x97   : > { %1642 = vmatpush1.bf16.msra.mxu0 %v1641_v11  ;;  %v369_v44 = vld [vmem:[%s2627_s27 + $0x268] sm:$0xff]  ;;  %v371_v46 = vld [vmem:[%s2627_s27 + $0x278] sm:$0xff]  ;;  %v368_v51 = vld [vmem:[%s2627_s27 + $0x260] sm:$0xff] }
  0x98   : > { %1898 = vmatpush1.bf16.msra.mxu1 %v1897_v12  ;;  %1644 = vmatprep.subr.bf16.mxu0 %v1643_v13  ;;  %v1655_v49 = vpack.c.bf16 %v369_v44, %v365_v43  ;;  %v366_v52 = vld [vmem:[%s2627_s27 + $0x250] sm:$0xff]  ;;  %v1911_v53 = vpack.c.bf16 %v371_v46, %v367_v45  ;;  %v373_v55 = vld [vmem:[%s2627_s27 + $0x288] sm:$0xff]  ;;  %v375_v57 = vld [vmem:[%s2627_s27 + $0x298] sm:$0xff]  ;;  %v1657_v59 = vpack.c.bf16 %v368_v51, %v364_v50 }
  0x99   : > { %1900 = vmatprep.subr.bf16.mxu1 %v1899_v17  ;;  %v370_v54 = vld [vmem:[%s2627_s27 + $0x270] sm:$0xff]  ;;  %v377_v56 = vld [vmem:[%s2627_s27 + $0x2a8] sm:$0xff]  ;;  %v379_v58 = vld [vmem:[%s2627_s27 + $0x2b8] sm:$0xff] }
  0x9a   : > { %v1913_v60 = vpack.c.bf16 %v370_v54, %v366_v52  ;;  %v1659_v61 = vpack.c.bf16 %v377_v56, %v373_v55  ;;  %v372_v62 = vld [vmem:[%s2627_s27 + $0x280] sm:$0xff]  ;;  %v374_v0 = vld [vmem:[%s2627_s27 + $0x290] sm:$0xff]  ;;  %v1915_v1 = vpack.c.bf16 %v379_v58, %v375_v57  ;;  %v381_v3 = vld [vmem:[%s2627_s27 + $0x2c8] sm:$0xff] }
  0x9b   : > { %1646 = vmatpush1.bf16.msra.mxu0 %v1645_v23  ;;  %v376_v63 = vld [vmem:[%s2627_s27 + $0x2a0] sm:$0xff]  ;;  %v378_v2 = vld [vmem:[%s2627_s27 + $0x2b0] sm:$0xff]  ;;  %v385_v4 = vld [vmem:[%s2627_s27 + $0x2e8] sm:$0xff] }
  0x9c   : > { %1902 = vmatpush1.bf16.msra.mxu1 %v1901_v24  ;;  %1648 = vmatprep.subr.bf16.mxu0 %v1647_v25  ;;  %v383_v5 = vld [vmem:[%s2627_s27 + $0x2d8] sm:$0xff]  ;;  %v1661_v7 = vpack.c.bf16 %v376_v63, %v372_v62  ;;  %v380_v8 = vld [vmem:[%s2627_s27 + $0x2c0] sm:$0xff]  ;;  %v1917_v9 = vpack.c.bf16 %v378_v2, %v374_v0  ;;  %v1663_v10 = vpack.c.bf16 %v385_v4, %v381_v3  ;;  %v382_v12 = vld [vmem:[%s2627_s27 + $0x2d0] sm:$0xff] }
  0x9d   : > { %1904 = vmatprep.subr.bf16.mxu1 %v1903_v29  ;;  %v387_v6 = vld [vmem:[%s2627_s27 + $0x2f8] sm:$0xff]  ;;  %v384_v11 = vld [vmem:[%s2627_s27 + $0x2e0] sm:$0xff]  ;;  %v386_v13 = vld [vmem:[%s2627_s27 + $0x2f0] sm:$0xff] }
  0x9e   : > { %v1919_v14 = vpack.c.bf16 %v387_v6, %v383_v5  ;;  %v389_v15 = vld [vmem:[%s2627_s27 + $0x308] sm:$0xff]  ;;  %v391_v18 = vld [vmem:[%s2627_s27 + $0x318] sm:$0xff]  ;;  %v1665_v20 = vpack.c.bf16 %v384_v11, %v380_v8  ;;  %v1921_v21 = vpack.c.bf16 %v386_v13, %v382_v12  ;;  %v388_v23 = vld [vmem:[%s2627_s27 + $0x300] sm:$0xff] }
  0x9f   : > { %1650 = vmatpush1.bf16.msra.mxu0 %v1649_v35  ;;  %v393_v16 = vld [vmem:[%s2627_s27 + $0x328] sm:$0xff]  ;;  %v395_v19 = vld [vmem:[%s2627_s27 + $0x338] sm:$0xff]  ;;  %v392_v24 = vld [vmem:[%s2627_s27 + $0x320] sm:$0xff] }
  0xa0   : > { %1906 = vmatpush1.bf16.msra.mxu1 %v1905_v36  ;;  %1652 = vmatprep.subr.bf16.mxu0 %v1651_v37  ;;  %v277_v17 = vld [vmem:[%s2620_s24 + $0x8] sm:$0xff]  ;;  %v1667_v22 = vpack.c.bf16 %v393_v16, %v389_v15  ;;  %v390_v25 = vld [vmem:[%s2627_s27 + $0x310] sm:$0xff]  ;;  %v1923_v26 = vpack.c.bf16 %v395_v19, %v391_v18  ;;  %v399_v30 = vld [vmem:[%s2627_s27 + $0x358] sm:$0xff]  ;;  %v1669_v32 = vpack.c.bf16 %v392_v24, %v388_v23 }
  0xa1   : > { %1908 = vmatprep.subr.bf16.mxu1 %v1907_v41  ;;  %868 = vmatprep.mubr.f32.mxu0 %v277_v17  ;;  %v394_v27 = vld [vmem:[%s2627_s27 + $0x330] sm:$0xff]  ;;  %v397_v28 = vld [vmem:[%s2627_s27 + $0x348] sm:$0xff]  ;;  %v403_v31 = vld [vmem:[%s2627_s27 + $0x378] sm:$0xff] }
  0xa2   : > { %1176 = vmatprep.mubr.f32.mxu1 %v277_v17  ;;  %v401_v29 = vld [vmem:[%s2627_s27 + $0x368] sm:$0xff]  ;;  %v1925_v33 = vpack.c.bf16 %v394_v27, %v390_v25  ;;  %v396_v35 = vld [vmem:[%s2627_s27 + $0x340] sm:$0xff]  ;;  %v398_v37 = vld [vmem:[%s2627_s27 + $0x350] sm:$0xff]  ;;  %v1927_v38 = vpack.c.bf16 %v403_v31, %v399_v30 }
  0xa3   : > { %1654 = vmatpush1.bf16.msra.mxu0 %v1653_v47  ;;  %v1671_v34 = vpack.c.bf16 %v401_v29, %v397_v28  ;;  %v400_v36 = vld [vmem:[%s2627_s27 + $0x360] sm:$0xff]  ;;  %v402_v39 = vld [vmem:[%s2627_s27 + $0x370] sm:$0xff]  ;;  %v405_v40 = vld [vmem:[%s2627_s27 + $0x388] sm:$0xff] }
  0xa4   : > { %1910 = vmatpush1.bf16.msra.mxu1 %v1909_v48  ;;  %1656 = vmatprep.subr.bf16.mxu0 %v1655_v49  ;;  %v409_v41 = vld [vmem:[%s2627_s27 + $0x3a8] sm:$0xff]  ;;  %v407_v42 = vld [vmem:[%s2627_s27 + $0x398] sm:$0xff]  ;;  %v1673_v44 = vpack.c.bf16 %v400_v36, %v396_v35  ;;  %v1929_v45 = vpack.c.bf16 %v402_v39, %v398_v37  ;;  %v404_v47 = vld [vmem:[%s2627_s27 + $0x380] sm:$0xff] }
  0xa5   : > { %1912 = vmatprep.subr.bf16.mxu1 %v1911_v53  ;;  %v411_v43 = vld [vmem:[%s2627_s27 + $0x3b8] sm:$0xff]  ;;  %v1675_v46 = vpack.c.bf16 %v409_v41, %v405_v40  ;;  %v408_v48 = vld [vmem:[%s2627_s27 + $0x3a0] sm:$0xff]  ;;  %v406_v49 = vld [vmem:[%s2627_s27 + $0x390] sm:$0xff] }
  0xa6   : > { %v1931_v50 = vpack.c.bf16 %v411_v43, %v407_v42  ;;  %v410_v51 = vld [vmem:[%s2627_s27 + $0x3b0] sm:$0xff]  ;;  %v413_v52 = vld [vmem:[%s2627_s27 + $0x3c8] sm:$0xff]  ;;  %v415_v54 = vld [vmem:[%s2627_s27 + $0x3d8] sm:$0xff]  ;;  %v1677_v56 = vpack.c.bf16 %v408_v48, %v404_v47 }
  0xa7   : > { %1658 = vmatpush1.bf16.msra.mxu0 %v1657_v59  ;;  %v417_v53 = vld [vmem:[%s2627_s27 + $0x3e8] sm:$0xff]  ;;  %v419_v55 = vld [vmem:[%s2627_s27 + $0x3f8] sm:$0xff]  ;;  %v1933_v57 = vpack.c.bf16 %v410_v51, %v406_v49  ;;  %v412_v59 = vld [vmem:[%s2627_s27 + $0x3c0] sm:$0xff] }
  0xa8   : > { %1914 = vmatpush1.bf16.msra.mxu1 %v1913_v60  ;;  %1660 = vmatprep.subr.bf16.mxu0 %v1659_v61  ;;  %v1679_v58 = vpack.c.bf16 %v417_v53, %v413_v52  ;;  %v416_v60 = vld [vmem:[%s2627_s27 + $0x3e0] sm:$0xff]  ;;  %v414_v61 = vld [vmem:[%s2627_s27 + $0x3d0] sm:$0xff]  ;;  %v1935_v62 = vpack.c.bf16 %v419_v55, %v415_v54  ;;  %v421_v0 = vld [vmem:[%s2627_s27 + $0x408] sm:$0xff] }
  0xa9   : > { %1916 = vmatprep.subr.bf16.mxu1 %v1915_v1  ;;  %v418_v63 = vld [vmem:[%s2627_s27 + $0x3f0] sm:$0xff]  ;;  %v425_v1 = vld [vmem:[%s2627_s27 + $0x428] sm:$0xff]  ;;  %v423_v2 = vld [vmem:[%s2627_s27 + $0x418] sm:$0xff]  ;;  %v1681_v4 = vpack.c.bf16 %v416_v60, %v412_v59 }
  0xaa   : > { %v427_v3 = vld [vmem:[%s2627_s27 + $0x438] sm:$0xff]  ;;  %v1937_v5 = vpack.c.bf16 %v418_v63, %v414_v61  ;;  %v1683_v6 = vpack.c.bf16 %v425_v1, %v421_v0  ;;  %v424_v8 = vld [vmem:[%s2627_s27 + $0x420] sm:$0xff]  ;;  %v426_v11 = vld [vmem:[%s2627_s27 + $0x430] sm:$0xff] }
  0xab   : > { %1662 = vmatpush1.bf16.msra.mxu0 %v1661_v7  ;;  %v420_v7 = vld [vmem:[%s2627_s27 + $0x400] sm:$0xff]  ;;  %v429_v12 = vld [vmem:[%s2627_s27 + $0x448] sm:$0xff]  ;;  %v435_v15 = vld [vmem:[%s2627_s27 + $0x478] sm:$0xff] }
  0xac   : > { %1918 = vmatpush1.bf16.msra.mxu1 %v1917_v9  ;;  %1664 = vmatprep.subr.bf16.mxu0 %v1663_v10  ;;  %v422_v9 = vld [vmem:[%s2627_s27 + $0x410] sm:$0xff]  ;;  %v1939_v10 = vpack.c.bf16 %v427_v3, %v423_v2  ;;  %v433_v13 = vld [vmem:[%s2627_s27 + $0x468] sm:$0xff]  ;;  %v276_v16 = vld [vmem:[%s2620_s24] sm:$0xff]  ;;  %v1685_v17 = vpack.c.bf16 %v424_v8, %v420_v7 }
  0xad   : > { %1920 = vmatprep.subr.bf16.mxu1 %v1919_v14  ;;  %v431_v14 = vld [vmem:[%s2627_s27 + $0x458] sm:$0xff]  ;;  %v1941_v18 = vpack.c.bf16 %v426_v11, %v422_v9  ;;  %v1687_v19 = vpack.c.bf16 %v433_v13, %v429_v12  ;;  %v434_v24 = vld [vmem:[%s2627_s27 + $0x470] sm:$0xff]  ;;  %v437_v25 = vld [vmem:[%s2627_s27 + $0x488] sm:$0xff] }
  0xae   : > { %v1943_v23 = vpack.c.bf16 %v435_v15, %v431_v14  ;;  %v439_v27 = vld [vmem:[%s2627_s27 + $0x498] sm:$0xff]  ;;  %v442_v36 = vld [vmem:[%s2627_s27 + $0x4b0] sm:$0xff]  ;;  %v445_v37 = vld [vmem:[%s2627_s27 + $0x4c8] sm:$0xff] }
  0xaf   : > { %1666 = vmatpush1.bf16.msra.mxu0 %v1665_v20  ;;  %v428_v20 = vld [vmem:[%s2627_s27 + $0x440] sm:$0xff]  ;;  %v443_v28 = vld [vmem:[%s2627_s27 + $0x4b8] sm:$0xff]  ;;  %v450_v48 = vld [vmem:[%s2627_s27 + $0x4f0] sm:$0xff] }
  0xb0   : > { %1922 = vmatpush1.bf16.msra.mxu1 %v1921_v21  ;;  %1668 = vmatprep.subr.bf16.mxu0 %v1667_v22  ;;  %v432_v21 = vld [vmem:[%s2627_s27 + $0x460] sm:$0xff]  ;;  %v430_v22 = vld [vmem:[%s2627_s27 + $0x450] sm:$0xff]  ;;  %v1947_v35 = vpack.c.bf16 %v443_v28, %v439_v27  ;;  %v447_v39 = vld [vmem:[%s2627_s27 + $0x4d8] sm:$0xff] }
  0xb1   : > { %1924 = vmatprep.subr.bf16.mxu1 %v1923_v26  ;;  %v441_v26 = vld [vmem:[%s2627_s27 + $0x4a8] sm:$0xff]  ;;  %v1689_v29 = vpack.c.bf16 %v432_v21, %v428_v20  ;;  %v1945_v30 = vpack.c.bf16 %v434_v24, %v430_v22  ;;  %v451_v40 = vld [vmem:[%s2627_s27 + $0x4f8] sm:$0xff]  ;;  %v458_v60 = vld [vmem:[%s2627_s27 + $0x530] sm:$0xff] }
  0xb2   : > { %v1691_v31 = vpack.c.bf16 %v441_v26, %v437_v25  ;;  %v1951_v47 = vpack.c.bf16 %v451_v40, %v447_v39  ;;  %v453_v49 = vld [vmem:[%s2627_s27 + $0x508] sm:$0xff]  ;;  %v455_v51 = vld [vmem:[%s2627_s27 + $0x518] sm:$0xff]  ;;  %v466_v8 = vld [vmem:[%s2627_s27 + $0x570] sm:$0xff] }
  0xb3   : > { %1670 = vmatpush1.bf16.msra.mxu0 %v1669_v32  ;;  %v436_v32 = vld [vmem:[%s2627_s27 + $0x480] sm:$0xff]  ;;  %v459_v52 = vld [vmem:[%s2627_s27 + $0x538] sm:$0xff]  ;;  %v461_v61 = vld [vmem:[%s2627_s27 + $0x548] sm:$0xff] }
  0xb4   : > { %1926 = vmatpush1.bf16.msra.mxu1 %v1925_v33  ;;  %1672 = vmatprep.subr.bf16.mxu0 %v1671_v34  ;;  %v440_v33 = vld [vmem:[%s2627_s27 + $0x4a0] sm:$0xff]  ;;  %v438_v34 = vld [vmem:[%s2627_s27 + $0x490] sm:$0xff]  ;;  %v1955_v59 = vpack.c.bf16 %v459_v52, %v455_v51  ;;  %v463_v63 = vld [vmem:[%s2627_s27 + $0x558] sm:$0xff] }
  0xb5   : > { %1928 = vmatprep.subr.bf16.mxu1 %v1927_v38  ;;  %v449_v38 = vld [vmem:[%s2627_s27 + $0x4e8] sm:$0xff]  ;;  %v1693_v41 = vpack.c.bf16 %v440_v33, %v436_v32  ;;  %v1949_v42 = vpack.c.bf16 %v442_v36, %v438_v34  ;;  %v467_v0 = vld [vmem:[%s2627_s27 + $0x578] sm:$0xff]  ;;  %v468_v15 = vld [vmem:[%s2627_s27 + $0x580] sm:$0xff] }
  0xb6   : > { %v1695_v43 = vpack.c.bf16 %v449_v38, %v445_v37  ;;  %v1959_v7 = vpack.c.bf16 %v467_v0, %v463_v63  ;;  %v469_v9 = vld [vmem:[%s2627_s27 + $0x588] sm:$0xff]  ;;  %v471_v11 = vld [vmem:[%s2627_s27 + $0x598] sm:$0xff]  ;;  %v474_v20 = vld [vmem:[%s2627_s27 + $0x5b0] sm:$0xff] }
  0xb7   : > { %1674 = vmatpush1.bf16.msra.mxu0 %v1673_v44  ;;  %v444_v44 = vld [vmem:[%s2627_s27 + $0x4c0] sm:$0xff]  ;;  %v475_v12 = vld [vmem:[%s2627_s27 + $0x5b8] sm:$0xff]  ;;  %v285_v13 = vld [vmem:[%s2620_s24 + $0x48] sm:$0xff] }
  0xb8   : > { %1930 = vmatpush1.bf16.msra.mxu1 %v1929_v45  ;;  %1676 = vmatprep.subr.bf16.mxu0 %v1675_v46  ;;  %v448_v45 = vld [vmem:[%s2627_s27 + $0x4e0] sm:$0xff]  ;;  %v446_v46 = vld [vmem:[%s2627_s27 + $0x4d0] sm:$0xff]  ;;  %v1963_v22 = vpack.c.bf16 %v475_v12, %v471_v11  ;;  %v481_v24 = vld [vmem:[%s2627_s27 + $0x5e8] sm:$0xff] }
  0xb9   : > { %1932 = vmatprep.subr.bf16.mxu1 %v1931_v50  ;;  %v457_v50 = vld [vmem:[%s2627_s27 + $0x528] sm:$0xff]  ;;  %v1697_v53 = vpack.c.bf16 %v448_v45, %v444_v44  ;;  %v1953_v54 = vpack.c.bf16 %v450_v48, %v446_v46  ;;  %v284_v21 = vld [vmem:[%s2620_s24 + $0x40] sm:$0xff]  ;;  %v279_v25 = vld [vmem:[%s2620_s24 + $0x18] sm:$0xff] }
  0xba   : > { %v1699_v55 = vpack.c.bf16 %v457_v50, %v453_v49  ;;  %v479_v26 = vld [vmem:[%s2627_s27 + $0x5d8] sm:$0xff]  ;;  %v480_v32 = vld [vmem:[%s2627_s27 + $0x5e0] sm:$0xff]  ;;  %v478_v33 = vld [vmem:[%s2627_s27 + $0x5d0] sm:$0xff] }
  0xbb   : > { %1678 = vmatpush1.bf16.msra.mxu0 %v1677_v56  ;;  %v452_v56 = vld [vmem:[%s2627_s27 + $0x500] sm:$0xff]  ;;  %v483_v27 = vld [vmem:[%s2627_s27 + $0x5f8] sm:$0xff]  ;;  %v485_v36 = vld [vmem:[%s2627_s27 + $0x608] sm:$0xff] }
  0xbc   : > { %1934 = vmatpush1.bf16.msra.mxu1 %v1933_v57  ;;  %1680 = vmatprep.subr.bf16.mxu0 %v1679_v58  ;;  %v456_v57 = vld [vmem:[%s2627_s27 + $0x520] sm:$0xff]  ;;  %v454_v58 = vld [vmem:[%s2627_s27 + $0x510] sm:$0xff]  ;;  %v1967_v34 = vpack.c.bf16 %v483_v27, %v479_v26  ;;  %v489_v37 = vld [vmem:[%s2627_s27 + $0x628] sm:$0xff] }
  0xbd   : > { %1936 = vmatprep.subr.bf16.mxu1 %v1935_v62  ;;  %v465_v62 = vld [vmem:[%s2627_s27 + $0x568] sm:$0xff]  ;;  %v1701_v1 = vpack.c.bf16 %v456_v57, %v452_v56  ;;  %v1957_v2 = vpack.c.bf16 %v458_v60, %v454_v58  ;;  %v487_v38 = vld [vmem:[%s2627_s27 + $0x618] sm:$0xff]  ;;  %v488_v44 = vld [vmem:[%s2627_s27 + $0x620] sm:$0xff] }
  0xbe   : > { %v1703_v3 = vpack.c.bf16 %v465_v62, %v461_v61  ;;  %v491_v39 = vld [vmem:[%s2627_s27 + $0x638] sm:$0xff]  ;;  %v486_v45 = vld [vmem:[%s2627_s27 + $0x610] sm:$0xff]  ;;  %v493_v48 = vld [vmem:[%s2627_s27 + $0x648] sm:$0xff] }
  0xbf   : > { %1682 = vmatpush1.bf16.msra.mxu0 %v1681_v4  ;;  %v460_v4 = vld [vmem:[%s2627_s27 + $0x540] sm:$0xff]  ;;  %v1971_v46 = vpack.c.bf16 %v491_v39, %v487_v38  ;;  %v497_v49 = vld [vmem:[%s2627_s27 + $0x668] sm:$0xff]  ;;  %v495_v50 = vld [vmem:[%s2627_s27 + $0x658] sm:$0xff] }
  0xc0   : > { %1938 = vmatpush1.bf16.msra.mxu1 %v1937_v5  ;;  %1684 = vmatprep.subr.bf16.mxu0 %v1683_v6  ;;  %v464_v5 = vld [vmem:[%s2627_s27 + $0x560] sm:$0xff]  ;;  %v462_v6 = vld [vmem:[%s2627_s27 + $0x550] sm:$0xff]  ;;  %v499_v51 = vld [vmem:[%s2627_s27 + $0x678] sm:$0xff] }
  0xc1   : > { %1940 = vmatprep.subr.bf16.mxu1 %v1939_v10  ;;  %v473_v10 = vld [vmem:[%s2627_s27 + $0x5a8] sm:$0xff]  ;;  %v1705_v14 = vpack.c.bf16 %v464_v5, %v460_v4  ;;  %v496_v56 = vld [vmem:[%s2627_s27 + $0x660] sm:$0xff]  ;;  %v494_v57 = vld [vmem:[%s2627_s27 + $0x650] sm:$0xff]  ;;  %v1975_v58 = vpack.c.bf16 %v499_v51, %v495_v50 }
  0xc2   : > { %869 = vmatmul.mubr.f32.vlgmr.msra.gmra.mrb[0].mxu0 %v276_v16  ;;  %v501_v60 = vld [vmem:[%s2627_s27 + $0x688] sm:$0xff]  ;;  %v503_v62 = vld [vmem:[%s2627_s27 + $0x698] sm:$0xff]  ;;  %v504_v4 = vld [vmem:[%s2627_s27 + $0x6a0] sm:$0xff] }
  0xc3   : > { %1686 = vmatpush1.bf16.msra.mxu0 %v1685_v17  ;;  %1177 = vmatmul.mubr.f32.vlgmr.msra.gmra.mrb[0].mxu1 %v276_v16  ;;  %v472_v16 = vld [vmem:[%s2627_s27 + $0x5a0] sm:$0xff]  ;;  %v1961_v17 = vpack.c.bf16 %v466_v8, %v462_v6  ;;  %v505_v61 = vld [vmem:[%s2627_s27 + $0x6a8] sm:$0xff]  ;;  %v507_v63 = vld [vmem:[%s2627_s27 + $0x6b8] sm:$0xff] }
  0xc4   : > { %1942 = vmatpush1.bf16.msra.mxu1 %v1941_v18  ;;  %1688 = vmatprep.subr.bf16.mxu0 %v1687_v19  ;;  %v1707_v18 = vpack.c.bf16 %v473_v10, %v469_v9  ;;  %v470_v19 = vld [vmem:[%s2627_s27 + $0x590] sm:$0xff]  ;;  %v1709_v28 = vpack.c.bf16 %v472_v16, %v468_v15  ;;  %v1979_v6 = vpack.c.bf16 %v507_v63, %v503_v62  ;;  %v509_v8 = vld [vmem:[%s2627_s27 + $0x6c8] sm:$0xff]  ;;  %v511_v10 = vld [vmem:[%s2627_s27 + $0x6d8] sm:$0xff] }
  0xc5   : > { %1944 = vmatprep.subr.bf16.mxu1 %v1943_v23  ;;  %874 = vmatprep.mubr.f32.mxu0 %v285_v13  ;;  %v477_v23 = vld [vmem:[%s2627_s27 + $0x5c8] sm:$0xff]  ;;  %v502_v5 = vld [vmem:[%s2627_s27 + $0x690] sm:$0xff]  ;;  %v515_v11 = vld [vmem:[%s2627_s27 + $0x6f8] sm:$0xff] }
  0xc6   : > { %1182 = vmatprep.mubr.f32.mxu1 %v285_v13  ;;  %875 = vmatmul.mubr.f32.gmra.mrb[2].mxu0 %v284_v21  ;;  %v513_v9 = vld [vmem:[%s2627_s27 + $0x6e8] sm:$0xff]  ;;  %v508_v15 = vld [vmem:[%s2627_s27 + $0x6c0] sm:$0xff] }
  0xc7   : > { %1690 = vmatpush1.bf16.msra.mxu0 %v1689_v29  ;;  %1183 = vmatmul.mubr.f32.gmra.mrb[2].mxu1 %v284_v21  ;;  %v1965_v29 = vpack.c.bf16 %v474_v20, %v470_v19  ;;  %v512_v16 = vld [vmem:[%s2627_s27 + $0x6e0] sm:$0xff]  ;;  %v514_v19 = vld [vmem:[%s2627_s27 + $0x6f0] sm:$0xff]  ;;  %v517_v20 = vld [vmem:[%s2627_s27 + $0x708] sm:$0xff] }
  0xc8   : > { %1946 = vmatpush1.bf16.msra.mxu1 %v1945_v30  ;;  %1692 = vmatprep.subr.bf16.mxu0 %v1691_v31  ;;  %v1711_v30 = vpack.c.bf16 %v481_v24, %v477_v23  ;;  %v476_v31 = vld [vmem:[%s2627_s27 + $0x5c0] sm:$0xff]  ;;  %v521_v21 = vld [vmem:[%s2627_s27 + $0x728] sm:$0xff]  ;;  %v523_v23 = vld [vmem:[%s2627_s27 + $0x738] sm:$0xff]  ;;  %v1729_v24 = vpack.c.bf16 %v512_v16, %v508_v15 }
  0xc9   : > { %1948 = vmatprep.subr.bf16.mxu1 %v1947_v35  ;;  %945 = vmatprep.mubr.f32.mxu0 %v279_v25  ;;  %v482_v35 = vld [vmem:[%s2627_s27 + $0x5f0] sm:$0xff]  ;;  %v1713_v40 = vpack.c.bf16 %v480_v32, %v476_v31  ;;  %v1731_v26 = vpack.c.bf16 %v521_v21, %v517_v20  ;;  %v516_v27 = vld [vmem:[%s2627_s27 + $0x700] sm:$0xff]  ;;  %v525_v32 = vld [vmem:[%s2627_s27 + $0x748] sm:$0xff] }
  0xca   : > { %1253 = vmatprep.mubr.f32.mxu1 %v279_v25  ;;  %v522_v31 = vld [vmem:[%s2627_s27 + $0x730] sm:$0xff]  ;;  %v524_v39 = vld [vmem:[%s2627_s27 + $0x740] sm:$0xff]  ;;  %v557_v16 = vld [vmem:[%s2627_s27 + $0x848] sm:$0xff] }
  0xcb   : > { %1694 = vmatpush1.bf16.msra.mxu0 %v1693_v41  ;;  %v1969_v41 = vpack.c.bf16 %v482_v35, %v478_v33  ;;  %v529_v33 = vld [vmem:[%s2627_s27 + $0x768] sm:$0xff]  ;;  %v531_v35 = vld [vmem:[%s2627_s27 + $0x778] sm:$0xff]  ;;  %v532_v51 = vld [vmem:[%s2627_s27 + $0x780] sm:$0xff] }
  0xcc   : > { %1950 = vmatpush1.bf16.msra.mxu1 %v1949_v42  ;;  %1696 = vmatprep.subr.bf16.mxu0 %v1695_v43  ;;  %v1715_v42 = vpack.c.bf16 %v489_v37, %v485_v36  ;;  %v484_v43 = vld [vmem:[%s2627_s27 + $0x600] sm:$0xff]  ;;  %v1735_v38 = vpack.c.bf16 %v529_v33, %v525_v32  ;;  %v554_v15 = vld [vmem:[%s2627_s27 + $0x830] sm:$0xff]  ;;  %v571_v32 = vld [vmem:[%s2627_s27 + $0x8b8] sm:$0xff] }
  0xcd   : > { %1952 = vmatprep.subr.bf16.mxu1 %v1951_v47  ;;  %v490_v47 = vld [vmem:[%s2627_s27 + $0x630] sm:$0xff]  ;;  %v1717_v52 = vpack.c.bf16 %v488_v44, %v484_v43  ;;  %v533_v44 = vld [vmem:[%s2627_s27 + $0x788] sm:$0xff]  ;;  %v540_v63 = vld [vmem:[%s2627_s27 + $0x7c0] sm:$0xff] }
  0xce   : > { %v530_v43 = vld [vmem:[%s2627_s27 + $0x770] sm:$0xff]  ;;  %v287_v33 = vld [vmem:[%s2620_s24 + $0x58] sm:$0xff] }
  0xcf   : > { %1698 = vmatpush1.bf16.msra.mxu0 %v1697_v53  ;;  %v1973_v53 = vpack.c.bf16 %v490_v47, %v486_v45  ;;  %v537_v45 = vld [vmem:[%s2627_s27 + $0x7a8] sm:$0xff]  ;;  %v539_v47 = vld [vmem:[%s2627_s27 + $0x7b8] sm:$0xff]  ;;  %v278_v20 = vld [vmem:[%s2620_s24 + $0x10] sm:$0xff] }
  0xd0   : > { %1954 = vmatpush1.bf16.msra.mxu1 %v1953_v54  ;;  %1700 = vmatprep.subr.bf16.mxu0 %v1699_v55  ;;  %v1719_v54 = vpack.c.bf16 %v497_v49, %v493_v48  ;;  %v492_v55 = vld [vmem:[%s2627_s27 + $0x640] sm:$0xff]  ;;  %v1739_v50 = vpack.c.bf16 %v537_v45, %v533_v44  ;;  %v577_v44 = vld [vmem:[%s2627_s27 + $0x8e8] sm:$0xff]  ;;  %v575_v45 = vld [vmem:[%s2627_s27 + $0x8d8] sm:$0xff] }
  0xd1   : > { %1956 = vmatprep.subr.bf16.mxu1 %v1955_v59  ;;  %v498_v59 = vld [vmem:[%s2627_s27 + $0x670] sm:$0xff]  ;;  %v1721_v0 = vpack.c.bf16 %v496_v56, %v492_v55  ;;  %v541_v56 = vld [vmem:[%s2627_s27 + $0x7c8] sm:$0xff] }
  0xd2   : > { %v538_v55 = vld [vmem:[%s2627_s27 + $0x7b0] sm:$0xff] }
  0xd3   : > { %1702 = vmatpush1.bf16.msra.mxu0 %v1701_v1  ;;  %v1977_v1 = vpack.c.bf16 %v498_v59, %v494_v57  ;;  %v545_v57 = vld [vmem:[%s2627_s27 + $0x7e8] sm:$0xff]  ;;  %v547_v59 = vld [vmem:[%s2627_s27 + $0x7f8] sm:$0xff] }
  0xd4   : > { %1958 = vmatpush1.bf16.msra.mxu1 %v1957_v2  ;;  %1704 = vmatprep.subr.bf16.mxu0 %v1703_v3  ;;  %v1723_v2 = vpack.c.bf16 %v505_v61, %v501_v60  ;;  %v500_v3 = vld [vmem:[%s2627_s27 + $0x680] sm:$0xff]  ;;  %v1743_v62 = vpack.c.bf16 %v545_v57, %v541_v56  ;;  %v581_v56 = vld [vmem:[%s2627_s27 + $0x908] sm:$0xff] }
  0xd5   : > { %1960 = vmatprep.subr.bf16.mxu1 %v1959_v7  ;;  %v506_v7 = vld [vmem:[%s2627_s27 + $0x6b0] sm:$0xff]  ;;  %v1725_v12 = vpack.c.bf16 %v504_v4, %v500_v3  ;;  %v549_v4 = vld [vmem:[%s2627_s27 + $0x808] sm:$0xff] }
  0xd6   : > { %v1981_v13 = vpack.c.bf16 %v506_v7, %v502_v5  ;;  %v546_v3 = vld [vmem:[%s2627_s27 + $0x7f0] sm:$0xff]  ;;  %v553_v5 = vld [vmem:[%s2627_s27 + $0x828] sm:$0xff]  ;;  %v555_v7 = vld [vmem:[%s2627_s27 + $0x838] sm:$0xff] }
  0xd7   : > { %1706 = vmatpush1.bf16.msra.mxu0 %v1705_v14  ;;  %v1727_v14 = vpack.c.bf16 %v513_v9, %v509_v8  ;;  %v585_v57 = vld [vmem:[%s2627_s27 + $0x928] sm:$0xff] }
  0xd8   : > { %1962 = vmatpush1.bf16.msra.mxu1 %v1961_v17  ;;  %1708 = vmatprep.subr.bf16.mxu0 %v1707_v18  ;;  %v510_v17 = vld [vmem:[%s2627_s27 + $0x6d0] sm:$0xff]  ;;  %v1983_v18 = vpack.c.bf16 %v515_v11, %v511_v10  ;;  %v1747_v10 = vpack.c.bf16 %v553_v5, %v549_v4  ;;  %v548_v11 = vld [vmem:[%s2627_s27 + $0x800] sm:$0xff]  ;;  %v589_v4 = vld [vmem:[%s2627_s27 + $0x948] sm:$0xff] }
  0xd9   : > { %1964 = vmatprep.subr.bf16.mxu1 %v1963_v22  ;;  %v519_v22 = vld [vmem:[%s2627_s27 + $0x718] sm:$0xff]  ;;  %v1985_v25 = vpack.c.bf16 %v514_v19, %v510_v17  ;;  %v561_v17 = vld [vmem:[%s2627_s27 + $0x868] sm:$0xff] }
  0xda   : > { %v563_v19 = vld [vmem:[%s2627_s27 + $0x878] sm:$0xff]  ;;  %v593_v5 = vld [vmem:[%s2627_s27 + $0x968] sm:$0xff] }
  0xdb   : > { %1710 = vmatpush1.bf16.msra.mxu0 %v1709_v28  ;;  %v520_v28 = vld [vmem:[%s2627_s27 + $0x720] sm:$0xff] }
  0xdc   : > { %1966 = vmatpush1.bf16.msra.mxu1 %v1965_v29  ;;  %1712 = vmatprep.subr.bf16.mxu0 %v1711_v30  ;;  %v518_v29 = vld [vmem:[%s2627_s27 + $0x710] sm:$0xff]  ;;  %v1987_v30 = vpack.c.bf16 %v523_v23, %v519_v22  ;;  %v1733_v36 = vpack.c.bf16 %v520_v28, %v516_v27  ;;  %v1751_v23 = vpack.c.bf16 %v561_v17, %v557_v16  ;;  %v597_v16 = vld [vmem:[%s2627_s27 + $0x988] sm:$0xff] }
  0xdd   : > { %1968 = vmatprep.subr.bf16.mxu1 %v1967_v34  ;;  %v527_v34 = vld [vmem:[%s2627_s27 + $0x758] sm:$0xff]  ;;  %v1989_v37 = vpack.c.bf16 %v522_v31, %v518_v29  ;;  %v562_v28 = vld [vmem:[%s2627_s27 + $0x870] sm:$0xff]  ;;  %v565_v29 = vld [vmem:[%s2627_s27 + $0x888] sm:$0xff] }
  0xde   : > { %v567_v31 = vld [vmem:[%s2627_s27 + $0x898] sm:$0xff]  ;;  %v601_v17 = vld [vmem:[%s2627_s27 + $0x9a8] sm:$0xff] }
  0xdf   : > { %1714 = vmatpush1.bf16.msra.mxu0 %v1713_v40  ;;  %v528_v40 = vld [vmem:[%s2627_s27 + $0x760] sm:$0xff] }
  0xe0   : > { %1970 = vmatpush1.bf16.msra.mxu1 %v1969_v41  ;;  %1716 = vmatprep.subr.bf16.mxu0 %v1715_v42  ;;  %v526_v41 = vld [vmem:[%s2627_s27 + $0x750] sm:$0xff]  ;;  %v1991_v42 = vpack.c.bf16 %v531_v35, %v527_v34  ;;  %v1737_v48 = vpack.c.bf16 %v528_v40, %v524_v39  ;;  %v568_v39 = vld [vmem:[%s2627_s27 + $0x8a0] sm:$0xff] }
  0xe1   : > { %1972 = vmatprep.subr.bf16.mxu1 %v1971_v46  ;;  %v535_v46 = vld [vmem:[%s2627_s27 + $0x798] sm:$0xff]  ;;  %v1993_v49 = vpack.c.bf16 %v530_v43, %v526_v41  ;;  %v286_v35 = vld [vmem:[%s2620_s24 + $0x50] sm:$0xff]  ;;  %v2011_v41 = vpack.c.bf16 %v571_v32, %v567_v31  ;;  %v573_v43 = vld [vmem:[%s2627_s27 + $0x8c8] sm:$0xff] }
  0xe2   : > { %v566_v40 = vld [vmem:[%s2627_s27 + $0x890] sm:$0xff]  ;;  %v611_v31 = vld [vmem:[%s2627_s27 + $0x9f8] sm:$0xff] }
  0xe3   : > { %1718 = vmatpush1.bf16.msra.mxu0 %v1717_v52  ;;  %v536_v52 = vld [vmem:[%s2627_s27 + $0x7a0] sm:$0xff] }
  0xe4   : > { %1974 = vmatpush1.bf16.msra.mxu1 %v1973_v53  ;;  %1720 = vmatprep.subr.bf16.mxu0 %v1719_v54  ;;  %v534_v53 = vld [vmem:[%s2627_s27 + $0x790] sm:$0xff]  ;;  %v1995_v54 = vpack.c.bf16 %v539_v47, %v535_v46  ;;  %v1741_v60 = vpack.c.bf16 %v536_v52, %v532_v51  ;;  %v579_v46 = vld [vmem:[%s2627_s27 + $0x8f8] sm:$0xff]  ;;  %v281_v47 = vld [vmem:[%s2620_s24 + $0x28] sm:$0xff] }
  0xe5   : > { %1976 = vmatprep.subr.bf16.mxu1 %v1975_v58  ;;  %v543_v58 = vld [vmem:[%s2627_s27 + $0x7d8] sm:$0xff]  ;;  %v1997_v61 = vpack.c.bf16 %v538_v55, %v534_v53  ;;  %v572_v51 = vld [vmem:[%s2627_s27 + $0x8c0] sm:$0xff]  ;;  %v574_v53 = vld [vmem:[%s2627_s27 + $0x8d0] sm:$0xff] }
  0xe6   : > { %v576_v52 = vld [vmem:[%s2627_s27 + $0x8e0] sm:$0xff]  ;;  %v578_v55 = vld [vmem:[%s2627_s27 + $0x8f0] sm:$0xff] }
  0xe7   : > { %1722 = vmatpush1.bf16.msra.mxu0 %v1721_v0  ;;  %v544_v0 = vld [vmem:[%s2627_s27 + $0x7e0] sm:$0xff] }
  0xe8   : > { %1978 = vmatpush1.bf16.msra.mxu1 %v1977_v1  ;;  %1724 = vmatprep.subr.bf16.mxu0 %v1723_v2  ;;  %v542_v1 = vld [vmem:[%s2627_s27 + $0x7d0] sm:$0xff]  ;;  %v1999_v2 = vpack.c.bf16 %v547_v59, %v543_v58  ;;  %v1745_v8 = vpack.c.bf16 %v544_v0, %v540_v63  ;;  %v583_v58 = vld [vmem:[%s2627_s27 + $0x918] sm:$0xff]  ;;  %v580_v63 = vld [vmem:[%s2627_s27 + $0x900] sm:$0xff] }
  0xe9   : > { %1980 = vmatprep.subr.bf16.mxu1 %v1979_v6  ;;  %v551_v6 = vld [vmem:[%s2627_s27 + $0x818] sm:$0xff]  ;;  %v2001_v9 = vpack.c.bf16 %v546_v3, %v542_v1  ;;  %v584_v0 = vld [vmem:[%s2627_s27 + $0x920] sm:$0xff]  ;;  %v582_v1 = vld [vmem:[%s2627_s27 + $0x910] sm:$0xff] }
  0xea   : > { %v587_v59 = vld [vmem:[%s2627_s27 + $0x938] sm:$0xff]  ;;  %v586_v3 = vld [vmem:[%s2627_s27 + $0x930] sm:$0xff] }
  0xeb   : > { %1726 = vmatpush1.bf16.msra.mxu0 %v1725_v12  ;;  %v552_v12 = vld [vmem:[%s2627_s27 + $0x820] sm:$0xff] }
  0xec   : > { %1982 = vmatpush1.bf16.msra.mxu1 %v1981_v13  ;;  %1728 = vmatprep.subr.bf16.mxu0 %v1727_v14  ;;  %v550_v13 = vld [vmem:[%s2627_s27 + $0x810] sm:$0xff]  ;;  %v2003_v14 = vpack.c.bf16 %v555_v7, %v551_v6  ;;  %v1749_v21 = vpack.c.bf16 %v552_v12, %v548_v11  ;;  %v591_v6 = vld [vmem:[%s2627_s27 + $0x958] sm:$0xff]  ;;  %v588_v11 = vld [vmem:[%s2627_s27 + $0x940] sm:$0xff] }
  0xed   : > { %1984 = vmatprep.subr.bf16.mxu1 %v1983_v18  ;;  %v559_v18 = vld [vmem:[%s2627_s27 + $0x858] sm:$0xff]  ;;  %v2005_v22 = vpack.c.bf16 %v554_v15, %v550_v13  ;;  %v592_v12 = vld [vmem:[%s2627_s27 + $0x960] sm:$0xff]  ;;  %v590_v13 = vld [vmem:[%s2627_s27 + $0x950] sm:$0xff] }
  0xee   : > { %v2007_v27 = vpack.c.bf16 %v563_v19, %v559_v18  ;;  %v595_v7 = vld [vmem:[%s2627_s27 + $0x978] sm:$0xff]  ;;  %v594_v15 = vld [vmem:[%s2627_s27 + $0x970] sm:$0xff] }
  0xef   : > { %1730 = vmatpush1.bf16.msra.mxu0 %v1729_v24  ;;  %v556_v24 = vld [vmem:[%s2627_s27 + $0x840] sm:$0xff]  ;;  %v599_v18 = vld [vmem:[%s2627_s27 + $0x998] sm:$0xff] }
  0xf0   : > { %1986 = vmatpush1.bf16.msra.mxu1 %v1985_v25  ;;  %1732 = vmatprep.subr.bf16.mxu0 %v1731_v26  ;;  %v560_v25 = vld [vmem:[%s2627_s27 + $0x860] sm:$0xff]  ;;  %v558_v26 = vld [vmem:[%s2627_s27 + $0x850] sm:$0xff]  ;;  %v603_v19 = vld [vmem:[%s2627_s27 + $0x9b8] sm:$0xff] }
  0xf1   : > { %1988 = vmatprep.subr.bf16.mxu1 %v1987_v30  ;;  %v569_v30 = vld [vmem:[%s2627_s27 + $0x8a8] sm:$0xff]  ;;  %v1753_v34 = vpack.c.bf16 %v560_v25, %v556_v24  ;;  %v600_v24 = vld [vmem:[%s2627_s27 + $0x9a0] sm:$0xff]  ;;  %v598_v25 = vld [vmem:[%s2627_s27 + $0x990] sm:$0xff] }
  0xf3   : > { %1734 = vmatpush1.bf16.msra.mxu0 %v1733_v36  ;;  %v2009_v36 = vpack.c.bf16 %v562_v28, %v558_v26  ;;  %v2027_v26 = vpack.c.bf16 %v603_v19, %v599_v18  ;;  %v605_v28 = vld [vmem:[%s2627_s27 + $0x9c8] sm:$0xff]  ;;  %v636_v19 = vld [vmem:[%s2627_s27 + $0xac0] sm:$0xff] }
  0xf4   : > { %1990 = vmatpush1.bf16.msra.mxu1 %v1989_v37  ;;  %1736 = vmatprep.subr.bf16.mxu0 %v1735_v38  ;;  %v1755_v37 = vpack.c.bf16 %v569_v30, %v565_v29  ;;  %v564_v38 = vld [vmem:[%s2627_s27 + $0x880] sm:$0xff]  ;;  %v609_v29 = vld [vmem:[%s2627_s27 + $0x9e8] sm:$0xff]  ;;  %v607_v30 = vld [vmem:[%s2627_s27 + $0x9d8] sm:$0xff] }
  0xf5   : > { %1992 = vmatprep.subr.bf16.mxu1 %v1991_v42  ;;  %v570_v42 = vld [vmem:[%s2627_s27 + $0x8b0] sm:$0xff] }
  0xf7   : > { %1738 = vmatpush1.bf16.msra.mxu0 %v1737_v48  ;;  %v1757_v48 = vpack.c.bf16 %v568_v39, %v564_v38  ;;  %v2031_v38 = vpack.c.bf16 %v611_v31, %v607_v30  ;;  %v610_v39 = vld [vmem:[%s2627_s27 + $0x9f0] sm:$0xff]  ;;  %v644_v31 = vld [vmem:[%s2627_s27 + $0xb00] sm:$0xff] }
  0xf8   : > { %1994 = vmatpush1.bf16.msra.mxu1 %v1993_v49  ;;  %1740 = vmatprep.subr.bf16.mxu0 %v1739_v50  ;;  %v2013_v49 = vpack.c.bf16 %v570_v42, %v566_v40  ;;  %v1759_v50 = vpack.c.bf16 %v577_v44, %v573_v43  ;;  %v613_v40 = vld [vmem:[%s2627_s27 + $0xa08] sm:$0xff]  ;;  %v615_v42 = vld [vmem:[%s2627_s27 + $0xa18] sm:$0xff] }
  0xf9   : > { %1996 = vmatprep.subr.bf16.mxu1 %v1995_v54  ;;  %v2015_v54 = vpack.c.bf16 %v579_v46, %v575_v45  ;;  %v619_v43 = vld [vmem:[%s2627_s27 + $0xa38] sm:$0xff] }
  0xfb   : > { %1742 = vmatpush1.bf16.msra.mxu0 %v1741_v60  ;;  %v1761_v60 = vpack.c.bf16 %v576_v52, %v572_v51  ;;  %v618_v51 = vld [vmem:[%s2627_s27 + $0xa30] sm:$0xff]  ;;  %v621_v52 = vld [vmem:[%s2627_s27 + $0xa48] sm:$0xff] }
  0xfc   : > { %1998 = vmatpush1.bf16.msra.mxu1 %v1997_v61  ;;  %1744 = vmatprep.subr.bf16.mxu0 %v1743_v62  ;;  %v2017_v61 = vpack.c.bf16 %v578_v55, %v574_v53  ;;  %v1763_v62 = vpack.c.bf16 %v585_v57, %v581_v56  ;;  %v625_v53 = vld [vmem:[%s2627_s27 + $0xa68] sm:$0xff]  ;;  %v627_v55 = vld [vmem:[%s2627_s27 + $0xa78] sm:$0xff] }
  0xfd   : > { %2000 = vmatprep.subr.bf16.mxu1 %v1999_v2  ;;  %v2019_v2 = vpack.c.bf16 %v587_v59, %v583_v58  ;;  %v1783_v58 = vpack.c.bf16 %v625_v53, %v621_v52  ;;  %v620_v59 = vld [vmem:[%s2627_s27 + $0xa40] sm:$0xff] }
  0xff   : > { %1746 = vmatpush1.bf16.msra.mxu0 %v1745_v8  ;;  %v1765_v8 = vpack.c.bf16 %v584_v0, %v580_v63  ;;  %v626_v63 = vld [vmem:[%s2627_s27 + $0xa70] sm:$0xff]  ;;  %v629_v0 = vld [vmem:[%s2627_s27 + $0xa88] sm:$0xff] }
 0x100   : > { %2002 = vmatpush1.bf16.msra.mxu1 %v2001_v9  ;;  %1748 = vmatprep.subr.bf16.mxu0 %v1747_v10  ;;  %v2021_v9 = vpack.c.bf16 %v586_v3, %v582_v1  ;;  %v1767_v10 = vpack.c.bf16 %v593_v5, %v589_v4  ;;  %v633_v1 = vld [vmem:[%s2627_s27 + $0xaa8] sm:$0xff]  ;;  %v635_v3 = vld [vmem:[%s2627_s27 + $0xab8] sm:$0xff] }
 0x101   : > { %2004 = vmatprep.subr.bf16.mxu1 %v2003_v14  ;;  %v2023_v14 = vpack.c.bf16 %v595_v7, %v591_v6  ;;  %v1787_v6 = vpack.c.bf16 %v633_v1, %v629_v0  ;;  %v628_v7 = vld [vmem:[%s2627_s27 + $0xa80] sm:$0xff] }
 0x102   : > { %946 = vmatmul.mubr.f32.vlgmr.msra.gmra.mrb[0].mxu0 %v278_v20 }
 0x103   : > { %1750 = vmatpush1.bf16.msra.mxu0 %v1749_v21  ;;  %1254 = vmatmul.mubr.f32.vlgmr.msra.gmra.mrb[0].mxu1 %v278_v20  ;;  %v1769_v20 = vpack.c.bf16 %v592_v12, %v588_v11  ;;  %v2025_v21 = vpack.c.bf16 %v594_v15, %v590_v13  ;;  %v634_v11 = vld [vmem:[%s2627_s27 + $0xab0] sm:$0xff]  ;;  %v637_v12 = vld [vmem:[%s2627_s27 + $0xac8] sm:$0xff]  ;;  %v643_v15 = vld [vmem:[%s2627_s27 + $0xaf8] sm:$0xff] }
 0x104   : > { %2006 = vmatpush1.bf16.msra.mxu1 %v2005_v22  ;;  %1752 = vmatprep.subr.bf16.mxu0 %v1751_v23  ;;  %v1771_v22 = vpack.c.bf16 %v601_v17, %v597_v16  ;;  %v596_v23 = vld [vmem:[%s2627_s27 + $0x980] sm:$0xff]  ;;  %v641_v13 = vld [vmem:[%s2627_s27 + $0xae8] sm:$0xff] }
 0x105   : > { %2008 = vmatprep.subr.bf16.mxu1 %v2007_v27  ;;  %951 = vmatprep.mubr.f32.mxu0 %v287_v33  ;;  %v602_v27 = vld [vmem:[%s2627_s27 + $0x9b0] sm:$0xff]  ;;  %v1773_v32 = vpack.c.bf16 %v600_v24, %v596_v23  ;;  %v1791_v18 = vpack.c.bf16 %v641_v13, %v637_v12  ;;  %v645_v24 = vld [vmem:[%s2627_s27 + $0xb08] sm:$0xff] }
 0x106   : > { %1259 = vmatprep.mubr.f32.mxu1 %v287_v33  ;;  %952 = vmatmul.mubr.f32.gmra.mrb[2].mxu0 %v286_v35  ;;  %v2029_v33 = vpack.c.bf16 %v602_v27, %v598_v25  ;;  %v642_v23 = vld [vmem:[%s2627_s27 + $0xaf0] sm:$0xff]  ;;  %v649_v25 = vld [vmem:[%s2627_s27 + $0xb28] sm:$0xff]  ;;  %v651_v27 = vld [vmem:[%s2627_s27 + $0xb38] sm:$0xff] }
 0x107   : > { %1754 = vmatpush1.bf16.msra.mxu0 %v1753_v34  ;;  %1260 = vmatmul.mubr.f32.gmra.mrb[2].mxu1 %v286_v35  ;;  %v1775_v34 = vpack.c.bf16 %v609_v29, %v605_v28  ;;  %v604_v35 = vld [vmem:[%s2627_s27 + $0x9c0] sm:$0xff]  ;;  %v1795_v30 = vpack.c.bf16 %v649_v25, %v645_v24 }
 0x108   : > { %2010 = vmatpush1.bf16.msra.mxu1 %v2009_v36  ;;  %1756 = vmatprep.subr.bf16.mxu0 %v1755_v37  ;;  %v608_v36 = vld [vmem:[%s2627_s27 + $0x9e0] sm:$0xff]  ;;  %v606_v37 = vld [vmem:[%s2627_s27 + $0x9d0] sm:$0xff] }
 0x109   : > { %2012 = vmatprep.subr.bf16.mxu1 %v2011_v41  ;;  %1022 = vmatprep.mubr.f32.mxu0 %v281_v47  ;;  %v617_v41 = vld [vmem:[%s2627_s27 + $0xa28] sm:$0xff]  ;;  %v1777_v44 = vpack.c.bf16 %v608_v36, %v604_v35  ;;  %v2033_v45 = vpack.c.bf16 %v610_v39, %v606_v37  ;;  %v650_v35 = vld [vmem:[%s2627_s27 + $0xb30] sm:$0xff]  ;;  %v659_v39 = vld [vmem:[%s2627_s27 + $0xb78] sm:$0xff] }
 0x10a   : > { %1330 = vmatprep.mubr.f32.mxu1 %v281_v47  ;;  %v1779_v46 = vpack.c.bf16 %v617_v41, %v613_v40  ;;  %v612_v47 = vld [vmem:[%s2627_s27 + $0xa00] sm:$0xff]  ;;  %v653_v36 = vld [vmem:[%s2627_s27 + $0xb48] sm:$0xff] }
 0x10b   : > { %1758 = vmatpush1.bf16.msra.mxu0 %v1757_v48  ;;  %v616_v48 = vld [vmem:[%s2627_s27 + $0xa20] sm:$0xff]  ;;  %v657_v37 = vld [vmem:[%s2627_s27 + $0xb68] sm:$0xff] }
 0x10c   : > { %2014 = vmatpush1.bf16.msra.mxu1 %v2013_v49  ;;  %1760 = vmatprep.subr.bf16.mxu0 %v1759_v50  ;;  %v614_v49 = vld [vmem:[%s2627_s27 + $0xa10] sm:$0xff]  ;;  %v2035_v50 = vpack.c.bf16 %v619_v43, %v615_v42  ;;  %v1781_v56 = vpack.c.bf16 %v616_v48, %v612_v47  ;;  %v1799_v42 = vpack.c.bf16 %v657_v37, %v653_v36  ;;  %v652_v43 = vld [vmem:[%s2627_s27 + $0xb40] sm:$0xff]  ;;  %v661_v48 = vld [vmem:[%s2627_s27 + $0xb88] sm:$0xff] }
 0x10d   : > { %2016 = vmatprep.subr.bf16.mxu1 %v2015_v54  ;;  %v623_v54 = vld [vmem:[%s2627_s27 + $0xa58] sm:$0xff]  ;;  %v2037_v57 = vpack.c.bf16 %v618_v51, %v614_v49  ;;  %v658_v47 = vld [vmem:[%s2627_s27 + $0xb70] sm:$0xff]  ;;  %v665_v49 = vld [vmem:[%s2627_s27 + $0xba8] sm:$0xff] }
 0x10e   : > { %v667_v51 = vld [vmem:[%s2627_s27 + $0xbb8] sm:$0xff]  ;;  %v280_v24 = vld [vmem:[%s2620_s24 + $0x20] sm:$0xff]  ;;  %v289_v37 = vld [vmem:[%s2620_s24 + $0x68] sm:$0xff] }
 0x10f   : > { %1762 = vmatpush1.bf16.msra.mxu0 %v1761_v60  ;;  %v624_v60 = vld [vmem:[%s2627_s27 + $0xa60] sm:$0xff]  ;;  %v699_v36 = vld [vmem:[%s2627_s27 + $0xcb8] sm:$0xff] }
 0x110   : > { %2018 = vmatpush1.bf16.msra.mxu1 %v2017_v61  ;;  %1764 = vmatprep.subr.bf16.mxu0 %v1763_v62  ;;  %v622_v61 = vld [vmem:[%s2627_s27 + $0xa50] sm:$0xff]  ;;  %v2039_v62 = vpack.c.bf16 %v627_v55, %v623_v54  ;;  %v1785_v4 = vpack.c.bf16 %v624_v60, %v620_v59  ;;  %v1803_v54 = vpack.c.bf16 %v665_v49, %v661_v48  ;;  %v660_v55 = vld [vmem:[%s2627_s27 + $0xb80] sm:$0xff]  ;;  %v669_v60 = vld [vmem:[%s2627_s27 + $0xbc8] sm:$0xff] }
 0x111   : > { %2020 = vmatprep.subr.bf16.mxu1 %v2019_v2  ;;  %v631_v2 = vld [vmem:[%s2627_s27 + $0xa98] sm:$0xff]  ;;  %v2041_v5 = vpack.c.bf16 %v626_v63, %v622_v61  ;;  %v666_v59 = vld [vmem:[%s2627_s27 + $0xbb0] sm:$0xff]  ;;  %v673_v61 = vld [vmem:[%s2627_s27 + $0xbe8] sm:$0xff] }
 0x112   : > { %v675_v63 = vld [vmem:[%s2627_s27 + $0xbf8] sm:$0xff]  ;;  %v705_v48 = vld [vmem:[%s2627_s27 + $0xce8] sm:$0xff] }
 0x113   : > { %1766 = vmatpush1.bf16.msra.mxu0 %v1765_v8  ;;  %v632_v8 = vld [vmem:[%s2627_s27 + $0xaa0] sm:$0xff]  ;;  %v703_v49 = vld [vmem:[%s2627_s27 + $0xcd8] sm:$0xff] }
 0x114   : > { %2022 = vmatpush1.bf16.msra.mxu1 %v2021_v9  ;;  %1768 = vmatprep.subr.bf16.mxu0 %v1767_v10  ;;  %v630_v9 = vld [vmem:[%s2627_s27 + $0xa90] sm:$0xff]  ;;  %v2043_v10 = vpack.c.bf16 %v635_v3, %v631_v2  ;;  %v1789_v16 = vpack.c.bf16 %v632_v8, %v628_v7  ;;  %v1807_v2 = vpack.c.bf16 %v673_v61, %v669_v60  ;;  %v668_v3 = vld [vmem:[%s2627_s27 + $0xbc0] sm:$0xff]  ;;  %v677_v8 = vld [vmem:[%s2627_s27 + $0xc08] sm:$0xff] }
 0x115   : > { %2024 = vmatprep.subr.bf16.mxu1 %v2023_v14  ;;  %v639_v14 = vld [vmem:[%s2627_s27 + $0xad8] sm:$0xff]  ;;  %v2045_v17 = vpack.c.bf16 %v634_v11, %v630_v9  ;;  %v674_v7 = vld [vmem:[%s2627_s27 + $0xbf0] sm:$0xff]  ;;  %v681_v9 = vld [vmem:[%s2627_s27 + $0xc28] sm:$0xff] }
 0x116   : > { %v683_v11 = vld [vmem:[%s2627_s27 + $0xc38] sm:$0xff]  ;;  %v709_v60 = vld [vmem:[%s2627_s27 + $0xd08] sm:$0xff] }
 0x117   : > { %1770 = vmatpush1.bf16.msra.mxu0 %v1769_v20  ;;  %v640_v20 = vld [vmem:[%s2627_s27 + $0xae0] sm:$0xff]  ;;  %v713_v61 = vld [vmem:[%s2627_s27 + $0xd28] sm:$0xff] }
 0x118   : > { %2026 = vmatpush1.bf16.msra.mxu1 %v2025_v21  ;;  %1772 = vmatprep.subr.bf16.mxu0 %v1771_v22  ;;  %v638_v21 = vld [vmem:[%s2627_s27 + $0xad0] sm:$0xff]  ;;  %v2047_v22 = vpack.c.bf16 %v643_v15, %v639_v14  ;;  %v1793_v28 = vpack.c.bf16 %v640_v20, %v636_v19  ;;  %v1811_v14 = vpack.c.bf16 %v681_v9, %v677_v8  ;;  %v676_v15 = vld [vmem:[%s2627_s27 + $0xc00] sm:$0xff]  ;;  %v685_v20 = vld [vmem:[%s2627_s27 + $0xc48] sm:$0xff] }
 0x119   : > { %2028 = vmatprep.subr.bf16.mxu1 %v2027_v26  ;;  %v647_v26 = vld [vmem:[%s2627_s27 + $0xb18] sm:$0xff]  ;;  %v2049_v29 = vpack.c.bf16 %v642_v23, %v638_v21  ;;  %v682_v19 = vld [vmem:[%s2627_s27 + $0xc30] sm:$0xff]  ;;  %v689_v21 = vld [vmem:[%s2627_s27 + $0xc68] sm:$0xff] }
 0x11a   : > { %v691_v23 = vld [vmem:[%s2627_s27 + $0xc78] sm:$0xff]  ;;  %v717_v8 = vld [vmem:[%s2627_s27 + $0xd48] sm:$0xff] }
 0x11b   : > { %1774 = vmatpush1.bf16.msra.mxu0 %v1773_v32  ;;  %v648_v32 = vld [vmem:[%s2627_s27 + $0xb20] sm:$0xff]  ;;  %v721_v9 = vld [vmem:[%s2627_s27 + $0xd68] sm:$0xff] }
 0x11c   : > { %2030 = vmatpush1.bf16.msra.mxu1 %v2029_v33  ;;  %1776 = vmatprep.subr.bf16.mxu0 %v1775_v34  ;;  %v646_v33 = vld [vmem:[%s2627_s27 + $0xb10] sm:$0xff]  ;;  %v2051_v34 = vpack.c.bf16 %v651_v27, %v647_v26  ;;  %v1797_v40 = vpack.c.bf16 %v648_v32, %v644_v31  ;;  %v1815_v27 = vpack.c.bf16 %v689_v21, %v685_v20  ;;  %v725_v20 = vld [vmem:[%s2627_s27 + $0xd88] sm:$0xff] }
 0x11d   : > { %2032 = vmatprep.subr.bf16.mxu1 %v2031_v38  ;;  %v655_v38 = vld [vmem:[%s2627_s27 + $0xb58] sm:$0xff]  ;;  %v2053_v41 = vpack.c.bf16 %v650_v35, %v646_v33  ;;  %v690_v32 = vld [vmem:[%s2627_s27 + $0xc70] sm:$0xff]  ;;  %v693_v33 = vld [vmem:[%s2627_s27 + $0xc88] sm:$0xff] }
 0x11e   : > { %v695_v35 = vld [vmem:[%s2627_s27 + $0xc98] sm:$0xff]  ;;  %v729_v21 = vld [vmem:[%s2627_s27 + $0xda8] sm:$0xff] }
 0x11f   : > { %1778 = vmatpush1.bf16.msra.mxu0 %v1777_v44  ;;  %v656_v44 = vld [vmem:[%s2627_s27 + $0xb60] sm:$0xff] }
 0x120   : > { %2034 = vmatpush1.bf16.msra.mxu1 %v2033_v45  ;;  %1780 = vmatprep.subr.bf16.mxu0 %v1779_v46  ;;  %v654_v45 = vld [vmem:[%s2627_s27 + $0xb50] sm:$0xff]  ;;  %v2055_v46 = vpack.c.bf16 %v659_v39, %v655_v38  ;;  %v1801_v52 = vpack.c.bf16 %v656_v44, %v652_v43  ;;  %v288_v39 = vld [vmem:[%s2620_s24 + $0x60] sm:$0xff] }
 0x121   : > { %2036 = vmatprep.subr.bf16.mxu1 %v2035_v50  ;;  %v663_v50 = vld [vmem:[%s2627_s27 + $0xb98] sm:$0xff]  ;;  %v2057_v53 = vpack.c.bf16 %v658_v47, %v654_v45  ;;  %v696_v43 = vld [vmem:[%s2627_s27 + $0xca0] sm:$0xff]  ;;  %v694_v44 = vld [vmem:[%s2627_s27 + $0xc90] sm:$0xff]  ;;  %v2075_v45 = vpack.c.bf16 %v699_v36, %v695_v35 }
 0x122   : > { %v701_v47 = vld [vmem:[%s2627_s27 + $0xcc8] sm:$0xff]  ;;  %v739_v35 = vld [vmem:[%s2627_s27 + $0xdf8] sm:$0xff] }
 0x123   : > { %1782 = vmatpush1.bf16.msra.mxu0 %v1781_v56  ;;  %v664_v56 = vld [vmem:[%s2627_s27 + $0xba0] sm:$0xff] }
 0x124   : > { %2038 = vmatpush1.bf16.msra.mxu1 %v2037_v57  ;;  %1784 = vmatprep.subr.bf16.mxu0 %v1783_v58  ;;  %v662_v57 = vld [vmem:[%s2627_s27 + $0xb90] sm:$0xff]  ;;  %v2059_v58 = vpack.c.bf16 %v667_v51, %v663_v50  ;;  %v1805_v0 = vpack.c.bf16 %v664_v56, %v660_v55  ;;  %v707_v50 = vld [vmem:[%s2627_s27 + $0xcf8] sm:$0xff]  ;;  %v700_v55 = vld [vmem:[%s2627_s27 + $0xcc0] sm:$0xff] }
 0x125   : > { %2040 = vmatprep.subr.bf16.mxu1 %v2039_v62  ;;  %v671_v62 = vld [vmem:[%s2627_s27 + $0xbd8] sm:$0xff]  ;;  %v2061_v1 = vpack.c.bf16 %v666_v59, %v662_v57  ;;  %v704_v56 = vld [vmem:[%s2627_s27 + $0xce0] sm:$0xff]  ;;  %v702_v57 = vld [vmem:[%s2627_s27 + $0xcd0] sm:$0xff] }
 0x126   : > { %v283_v51 = vld [vmem:[%s2620_s24 + $0x38] sm:$0xff]  ;;  %v706_v59 = vld [vmem:[%s2627_s27 + $0xcf0] sm:$0xff] }
 0x127   : > { %1786 = vmatpush1.bf16.msra.mxu0 %v1785_v4  ;;  %v672_v4 = vld [vmem:[%s2627_s27 + $0xbe0] sm:$0xff] }
 0x128   : > { %2042 = vmatpush1.bf16.msra.mxu1 %v2041_v5  ;;  %1788 = vmatprep.subr.bf16.mxu0 %v1787_v6  ;;  %v670_v5 = vld [vmem:[%s2627_s27 + $0xbd0] sm:$0xff]  ;;  %v2063_v6 = vpack.c.bf16 %v675_v63, %v671_v62  ;;  %v1809_v12 = vpack.c.bf16 %v672_v4, %v668_v3  ;;  %v711_v62 = vld [vmem:[%s2627_s27 + $0xd18] sm:$0xff]  ;;  %v708_v3 = vld [vmem:[%s2627_s27 + $0xd00] sm:$0xff] }
 0x129   : > { %2044 = vmatprep.subr.bf16.mxu1 %v2043_v10  ;;  %v679_v10 = vld [vmem:[%s2627_s27 + $0xc18] sm:$0xff]  ;;  %v2065_v13 = vpack.c.bf16 %v674_v7, %v670_v5  ;;  %v712_v4 = vld [vmem:[%s2627_s27 + $0xd20] sm:$0xff]  ;;  %v710_v5 = vld [vmem:[%s2627_s27 + $0xd10] sm:$0xff] }
 0x12a   : > { %v715_v63 = vld [vmem:[%s2627_s27 + $0xd38] sm:$0xff]  ;;  %v714_v7 = vld [vmem:[%s2627_s27 + $0xd30] sm:$0xff] }
 0x12b   : > { %1790 = vmatpush1.bf16.msra.mxu0 %v1789_v16  ;;  %v680_v16 = vld [vmem:[%s2627_s27 + $0xc20] sm:$0xff] }
 0x12c   : > { %2046 = vmatpush1.bf16.msra.mxu1 %v2045_v17  ;;  %1792 = vmatprep.subr.bf16.mxu0 %v1791_v18  ;;  %v678_v17 = vld [vmem:[%s2627_s27 + $0xc10] sm:$0xff]  ;;  %v2067_v18 = vpack.c.bf16 %v683_v11, %v679_v10  ;;  %v1813_v25 = vpack.c.bf16 %v680_v16, %v676_v15  ;;  %v719_v10 = vld [vmem:[%s2627_s27 + $0xd58] sm:$0xff]  ;;  %v716_v15 = vld [vmem:[%s2627_s27 + $0xd40] sm:$0xff] }
 0x12d   : > { %2048 = vmatprep.subr.bf16.mxu1 %v2047_v22  ;;  %v687_v22 = vld [vmem:[%s2627_s27 + $0xc58] sm:$0xff]  ;;  %v2069_v26 = vpack.c.bf16 %v682_v19, %v678_v17  ;;  %v720_v16 = vld [vmem:[%s2627_s27 + $0xd60] sm:$0xff]  ;;  %v718_v17 = vld [vmem:[%s2627_s27 + $0xd50] sm:$0xff] }
 0x12e   : > { %v2071_v31 = vpack.c.bf16 %v691_v23, %v687_v22  ;;  %v723_v11 = vld [vmem:[%s2627_s27 + $0xd78] sm:$0xff]  ;;  %v722_v19 = vld [vmem:[%s2627_s27 + $0xd70] sm:$0xff] }
 0x12f   : > { %1794 = vmatpush1.bf16.msra.mxu0 %v1793_v28  ;;  %v684_v28 = vld [vmem:[%s2627_s27 + $0xc40] sm:$0xff]  ;;  %v727_v22 = vld [vmem:[%s2627_s27 + $0xd98] sm:$0xff] }
 0x130   : > { %2050 = vmatpush1.bf16.msra.mxu1 %v2049_v29  ;;  %1796 = vmatprep.subr.bf16.mxu0 %v1795_v30  ;;  %v688_v29 = vld [vmem:[%s2627_s27 + $0xc60] sm:$0xff]  ;;  %v686_v30 = vld [vmem:[%s2627_s27 + $0xc50] sm:$0xff]  ;;  %v731_v23 = vld [vmem:[%s2627_s27 + $0xdb8] sm:$0xff] }
 0x131   : > { %2052 = vmatprep.subr.bf16.mxu1 %v2051_v34  ;;  %v697_v34 = vld [vmem:[%s2627_s27 + $0xca8] sm:$0xff]  ;;  %v1817_v38 = vpack.c.bf16 %v688_v29, %v684_v28  ;;  %v728_v28 = vld [vmem:[%s2627_s27 + $0xda0] sm:$0xff]  ;;  %v726_v29 = vld [vmem:[%s2627_s27 + $0xd90] sm:$0xff] }
 0x133   : > { %1798 = vmatpush1.bf16.msra.mxu0 %v1797_v40  ;;  %v2073_v40 = vpack.c.bf16 %v690_v32, %v686_v30  ;;  %v2091_v30 = vpack.c.bf16 %v731_v23, %v727_v22  ;;  %v733_v32 = vld [vmem:[%s2627_s27 + $0xdc8] sm:$0xff]  ;;  %v764_v23 = vld [vmem:[%s2627_s27 + $0xec0] sm:$0xff] }
 0x134   : > { %2054 = vmatpush1.bf16.msra.mxu1 %v2053_v41  ;;  %1800 = vmatprep.subr.bf16.mxu0 %v1799_v42  ;;  %v1819_v41 = vpack.c.bf16 %v697_v34, %v693_v33  ;;  %v692_v42 = vld [vmem:[%s2627_s27 + $0xc80] sm:$0xff]  ;;  %v737_v33 = vld [vmem:[%s2627_s27 + $0xde8] sm:$0xff]  ;;  %v735_v34 = vld [vmem:[%s2627_s27 + $0xdd8] sm:$0xff] }
 0x135   : > { %2056 = vmatprep.subr.bf16.mxu1 %v2055_v46  ;;  %v698_v46 = vld [vmem:[%s2627_s27 + $0xcb0] sm:$0xff] }
 0x137   : > { %1802 = vmatpush1.bf16.msra.mxu0 %v1801_v52  ;;  %v1821_v52 = vpack.c.bf16 %v696_v43, %v692_v42  ;;  %v2095_v42 = vpack.c.bf16 %v739_v35, %v735_v34  ;;  %v738_v43 = vld [vmem:[%s2627_s27 + $0xdf0] sm:$0xff]  ;;  %v772_v35 = vld [vmem:[%s2627_s27 + $0xf00] sm:$0xff] }
 0x138   : > { %2058 = vmatpush1.bf16.msra.mxu1 %v2057_v53  ;;  %1804 = vmatprep.subr.bf16.mxu0 %v1803_v54  ;;  %v2077_v53 = vpack.c.bf16 %v698_v46, %v694_v44  ;;  %v1823_v54 = vpack.c.bf16 %v705_v48, %v701_v47  ;;  %v741_v44 = vld [vmem:[%s2627_s27 + $0xe08] sm:$0xff]  ;;  %v743_v46 = vld [vmem:[%s2627_s27 + $0xe18] sm:$0xff] }
 0x139   : > { %2060 = vmatprep.subr.bf16.mxu1 %v2059_v58  ;;  %v2079_v58 = vpack.c.bf16 %v707_v50, %v703_v49  ;;  %v747_v47 = vld [vmem:[%s2627_s27 + $0xe38] sm:$0xff] }
 0x13b   : > { %1806 = vmatpush1.bf16.msra.mxu0 %v1805_v0  ;;  %v1825_v0 = vpack.c.bf16 %v704_v56, %v700_v55  ;;  %v746_v55 = vld [vmem:[%s2627_s27 + $0xe30] sm:$0xff]  ;;  %v749_v56 = vld [vmem:[%s2627_s27 + $0xe48] sm:$0xff] }
 0x13c   : > { %2062 = vmatpush1.bf16.msra.mxu1 %v2061_v1  ;;  %1808 = vmatprep.subr.bf16.mxu0 %v1807_v2  ;;  %v2081_v1 = vpack.c.bf16 %v706_v59, %v702_v57  ;;  %v1827_v2 = vpack.c.bf16 %v713_v61, %v709_v60  ;;  %v753_v57 = vld [vmem:[%s2627_s27 + $0xe68] sm:$0xff]  ;;  %v755_v59 = vld [vmem:[%s2627_s27 + $0xe78] sm:$0xff] }
 0x13d   : > { %2064 = vmatprep.subr.bf16.mxu1 %v2063_v6  ;;  %v2083_v6 = vpack.c.bf16 %v715_v63, %v711_v62  ;;  %v1847_v62 = vpack.c.bf16 %v753_v57, %v749_v56  ;;  %v748_v63 = vld [vmem:[%s2627_s27 + $0xe40] sm:$0xff] }
 0x13f   : > { %1810 = vmatpush1.bf16.msra.mxu0 %v1809_v12  ;;  %v1829_v12 = vpack.c.bf16 %v712_v4, %v708_v3  ;;  %v754_v3 = vld [vmem:[%s2627_s27 + $0xe70] sm:$0xff]  ;;  %v757_v4 = vld [vmem:[%s2627_s27 + $0xe88] sm:$0xff] }
 0x140   : > { %2066 = vmatpush1.bf16.msra.mxu1 %v2065_v13  ;;  %1812 = vmatprep.subr.bf16.mxu0 %v1811_v14  ;;  %v2085_v13 = vpack.c.bf16 %v714_v7, %v710_v5  ;;  %v1831_v14 = vpack.c.bf16 %v721_v9, %v717_v8  ;;  %v761_v5 = vld [vmem:[%s2627_s27 + $0xea8] sm:$0xff]  ;;  %v763_v7 = vld [vmem:[%s2627_s27 + $0xeb8] sm:$0xff] }
 0x141   : > { %2068 = vmatprep.subr.bf16.mxu1 %v2067_v18  ;;  %v2087_v18 = vpack.c.bf16 %v723_v11, %v719_v10  ;;  %v1851_v10 = vpack.c.bf16 %v761_v5, %v757_v4  ;;  %v756_v11 = vld [vmem:[%s2627_s27 + $0xe80] sm:$0xff] }
 0x142   : > { %1023 = vmatmul.mubr.f32.vlgmr.msra.gmra.mrb[0].mxu0 %v280_v24 }
 0x143   : > { %1814 = vmatpush1.bf16.msra.mxu0 %v1813_v25  ;;  %1331 = vmatmul.mubr.f32.vlgmr.msra.gmra.mrb[0].mxu1 %v280_v24  ;;  %v1833_v24 = vpack.c.bf16 %v720_v16, %v716_v15  ;;  %v2089_v25 = vpack.c.bf16 %v722_v19, %v718_v17  ;;  %v762_v15 = vld [vmem:[%s2627_s27 + $0xeb0] sm:$0xff]  ;;  %v765_v16 = vld [vmem:[%s2627_s27 + $0xec8] sm:$0xff]  ;;  %v771_v19 = vld [vmem:[%s2627_s27 + $0xef8] sm:$0xff] }
 0x144   : > { %2070 = vmatpush1.bf16.msra.mxu1 %v2069_v26  ;;  %1816 = vmatprep.subr.bf16.mxu0 %v1815_v27  ;;  %v1835_v26 = vpack.c.bf16 %v729_v21, %v725_v20  ;;  %v724_v27 = vld [vmem:[%s2627_s27 + $0xd80] sm:$0xff]  ;;  %v769_v17 = vld [vmem:[%s2627_s27 + $0xee8] sm:$0xff] }
 0x145   : > { %2072 = vmatprep.subr.bf16.mxu1 %v2071_v31  ;;  %1028 = vmatprep.mubr.f32.mxu0 %v289_v37  ;;  %v730_v31 = vld [vmem:[%s2627_s27 + $0xdb0] sm:$0xff]  ;;  %v1837_v36 = vpack.c.bf16 %v728_v28, %v724_v27  ;;  %v1855_v22 = vpack.c.bf16 %v769_v17, %v765_v16  ;;  %v773_v28 = vld [vmem:[%s2627_s27 + $0xf08] sm:$0xff]  ;;  %v268_v17 = vld [vmem:[#allocation2] sm:$0xff] }
 0x146   : > { %1336 = vmatprep.mubr.f32.mxu1 %v289_v37  ;;  %1029 = vmatmul.mubr.f32.gmra.mrb[2].mxu0 %v288_v39  ;;  %v2093_v37 = vpack.c.bf16 %v730_v31, %v726_v29  ;;  %v770_v27 = vld [vmem:[%s2627_s27 + $0xef0] sm:$0xff]  ;;  %v777_v29 = vld [vmem:[%s2627_s27 + $0xf28] sm:$0xff]  ;;  %v779_v31 = vld [vmem:[%s2627_s27 + $0xf38] sm:$0xff] }
 0x147   : > { %1818 = vmatpush1.bf16.msra.mxu0 %v1817_v38  ;;  %1337 = vmatmul.mubr.f32.gmra.mrb[2].mxu1 %v288_v39  ;;  %v1839_v38 = vpack.c.bf16 %v737_v33, %v733_v32  ;;  %v732_v39 = vld [vmem:[%s2627_s27 + $0xdc0] sm:$0xff]  ;;  %v1859_v34 = vpack.c.bf16 %v777_v29, %v773_v28  ;;  %v290_v16 = vld [vmem:[%s2620_s24 + $0x70] sm:$0xff] }
 0x148   : > { %2074 = vmatpush1.bf16.msra.mxu1 %v2073_v40  ;;  %1820 = vmatprep.subr.bf16.mxu0 %v1819_v41  ;;  %v736_v40 = vld [vmem:[%s2627_s27 + $0xde0] sm:$0xff]  ;;  %v734_v41 = vld [vmem:[%s2627_s27 + $0xdd0] sm:$0xff] }
 0x149   : > { %2076 = vmatprep.subr.bf16.mxu1 %v2075_v45  ;;  %1099 = vmatprep.mubr.f32.mxu0 %v283_v51  ;;  %v745_v45 = vld [vmem:[%s2627_s27 + $0xe28] sm:$0xff]  ;;  %v1841_v48 = vpack.c.bf16 %v736_v40, %v732_v39  ;;  %v2097_v49 = vpack.c.bf16 %v738_v43, %v734_v41  ;;  %v778_v39 = vld [vmem:[%s2627_s27 + $0xf30] sm:$0xff]  ;;  %v787_v43 = vld [vmem:[%s2627_s27 + $0xf78] sm:$0xff] }
 0x14a   : > { %1407 = vmatprep.mubr.f32.mxu1 %v283_v51  ;;  %v1843_v50 = vpack.c.bf16 %v745_v45, %v741_v44  ;;  %v740_v51 = vld [vmem:[%s2627_s27 + $0xe00] sm:$0xff]  ;;  %v781_v40 = vld [vmem:[%s2627_s27 + $0xf48] sm:$0xff] }
 0x14b   : > { %1822 = vmatpush1.bf16.msra.mxu0 %v1821_v52  ;;  %v744_v52 = vld [vmem:[%s2627_s27 + $0xe20] sm:$0xff]  ;;  %v785_v41 = vld [vmem:[%s2627_s27 + $0xf68] sm:$0xff] }
 0x14c   : > { %2078 = vmatpush1.bf16.msra.mxu1 %v2077_v53  ;;  %1824 = vmatprep.subr.bf16.mxu0 %v1823_v54  ;;  %v742_v53 = vld [vmem:[%s2627_s27 + $0xe10] sm:$0xff]  ;;  %v2099_v54 = vpack.c.bf16 %v747_v47, %v743_v46  ;;  %v1845_v60 = vpack.c.bf16 %v744_v52, %v740_v51  ;;  %v1863_v46 = vpack.c.bf16 %v785_v41, %v781_v40  ;;  %v780_v47 = vld [vmem:[%s2627_s27 + $0xf40] sm:$0xff]  ;;  %v789_v52 = vld [vmem:[%s2627_s27 + $0xf88] sm:$0xff]  ;;  %v1450_v41 = vlaneseq (!%p1611_p6) }
 0x14d   : > { %2080 = vmatprep.subr.bf16.mxu1 %v2079_v58  ;;  %v751_v58 = vld [vmem:[%s2627_s27 + $0xe58] sm:$0xff]  ;;  %v2101_v61 = vpack.c.bf16 %v746_v55, %v742_v53  ;;  %v786_v51 = vld [vmem:[%s2627_s27 + $0xf70] sm:$0xff]  ;;  %v793_v53 = vld [vmem:[%s2627_s27 + $0xfa8] sm:$0xff] }
 0x14e   : > { %v795_v55 = vld [vmem:[%s2627_s27 + $0xfb8] sm:$0xff]  ;;  %v272_v28 = vld [vmem:[#allocation2 + $0x20] sm:$0xff] }
 0x14f   : > { %1826 = vmatpush1.bf16.msra.mxu0 %v1825_v0  ;;  %v752_v0 = vld [vmem:[%s2627_s27 + $0xe60] sm:$0xff] }
 0x150   : > { %2082 = vmatpush1.bf16.msra.mxu1 %v2081_v1  ;;  %1828 = vmatprep.subr.bf16.mxu0 %v1827_v2  ;;  %v750_v1 = vld [vmem:[%s2627_s27 + $0xe50] sm:$0xff]  ;;  %v2103_v2 = vpack.c.bf16 %v755_v59, %v751_v58  ;;  %v1849_v8 = vpack.c.bf16 %v752_v0, %v748_v63  ;;  %v1867_v58 = vpack.c.bf16 %v793_v53, %v789_v52  ;;  %v788_v59 = vld [vmem:[%s2627_s27 + $0xf80] sm:$0xff]  ;;  %v797_v0 = vld [vmem:[%s2627_s27 + $0xfc8] sm:$0xff] }
 0x151   : > { %2084 = vmatprep.subr.bf16.mxu1 %v2083_v6  ;;  %v759_v6 = vld [vmem:[%s2627_s27 + $0xe98] sm:$0xff]  ;;  %v2105_v9 = vpack.c.bf16 %v754_v3, %v750_v1  ;;  %v794_v63 = vld [vmem:[%s2627_s27 + $0xfb0] sm:$0xff]  ;;  %v801_v1 = vld [vmem:[%s2627_s27 + $0xfe8] sm:$0xff] }
 0x152   : > { %v803_v3 = vld [vmem:[%s2627_s27 + $0xff8] sm:$0xff] }
 0x153   : > { %1830 = vmatpush1.bf16.msra.mxu0 %v1829_v12  ;;  %v760_v12 = vld [vmem:[%s2627_s27 + $0xea0] sm:$0xff] }
 0x154   : > { %2086 = vmatpush1.bf16.msra.mxu1 %v2085_v13  ;;  %1832 = vmatprep.subr.bf16.mxu0 %v1831_v14  ;;  %v758_v13 = vld [vmem:[%s2627_s27 + $0xe90] sm:$0xff]  ;;  %v2107_v14 = vpack.c.bf16 %v763_v7, %v759_v6  ;;  %v1853_v20 = vpack.c.bf16 %v760_v12, %v756_v11  ;;  %v1871_v6 = vpack.c.bf16 %v801_v1, %v797_v0  ;;  %v796_v7 = vld [vmem:[%s2627_s27 + $0xfc0] sm:$0xff] }
 0x155   : > { %2088 = vmatprep.subr.bf16.mxu1 %v2087_v18  ;;  %v767_v18 = vld [vmem:[%s2627_s27 + $0xed8] sm:$0xff]  ;;  %v2109_v21 = vpack.c.bf16 %v762_v15, %v758_v13  ;;  %v802_v11 = vld [vmem:[%s2627_s27 + $0xff0] sm:$0xff] }
 0x156   : > { %v291_v15 = vld [vmem:[%s2620_s24 + $0x78] sm:$0xff] }
 0x157   : > { %1834 = vmatpush1.bf16.msra.mxu0 %v1833_v24  ;;  %v768_v24 = vld [vmem:[%s2627_s27 + $0xee0] sm:$0xff] }
 0x158   : > { %2090 = vmatpush1.bf16.msra.mxu1 %v2089_v25  ;;  %1836 = vmatprep.subr.bf16.mxu0 %v1835_v26  ;;  %v766_v25 = vld [vmem:[%s2627_s27 + $0xed0] sm:$0xff]  ;;  %v2111_v26 = vpack.c.bf16 %v771_v19, %v767_v18  ;;  %v1857_v32 = vpack.c.bf16 %v768_v24, %v764_v23  ;;  %v269_v19 = vld [vmem:[#allocation2 + $0x8] sm:$0xff] }
 0x159   : > { %2092 = vmatprep.subr.bf16.mxu1 %v2091_v30  ;;  %v775_v30 = vld [vmem:[%s2627_s27 + $0xf18] sm:$0xff]  ;;  %v2113_v33 = vpack.c.bf16 %v770_v27, %v766_v25  ;;  %v270_v18 = vld [vmem:[#allocation2 + $0x10] sm:$0xff] }
 0x15b   : > { %1838 = vmatpush1.bf16.msra.mxu0 %v1837_v36  ;;  %v776_v36 = vld [vmem:[%s2627_s27 + $0xf20] sm:$0xff] }
 0x15c   : > { %2094 = vmatpush1.bf16.msra.mxu1 %v2093_v37  ;;  %1840 = vmatprep.subr.bf16.mxu0 %v1839_v38  ;;  %v774_v37 = vld [vmem:[%s2627_s27 + $0xf10] sm:$0xff]  ;;  %v2115_v38 = vpack.c.bf16 %v779_v31, %v775_v30  ;;  %v1861_v44 = vpack.c.bf16 %v776_v36, %v772_v35  ;;  %v273_v31 = vld [vmem:[#allocation2 + $0x28] sm:$0xff] }
 0x15d   : > { %2096 = vmatprep.subr.bf16.mxu1 %v2095_v42  ;;  %v783_v42 = vld [vmem:[%s2627_s27 + $0xf58] sm:$0xff]  ;;  %v2117_v45 = vpack.c.bf16 %v778_v39, %v774_v37  ;;  %v274_v30 = vld [vmem:[#allocation2 + $0x30] sm:$0xff] }
 0x15f   : > { %1842 = vmatpush1.bf16.msra.mxu0 %v1841_v48  ;;  %v784_v48 = vld [vmem:[%s2627_s27 + $0xf60] sm:$0xff] }
 0x160   : > { %2098 = vmatpush1.bf16.msra.mxu1 %v2097_v49  ;;  %1844 = vmatprep.subr.bf16.mxu0 %v1843_v50  ;;  %v782_v49 = vld [vmem:[%s2627_s27 + $0xf50] sm:$0xff]  ;;  %v2119_v50 = vpack.c.bf16 %v787_v43, %v783_v42  ;;  %v1865_v56 = vpack.c.bf16 %v784_v48, %v780_v47  ;;  %v1451_v42 = vshrl.u32 (!%p1611_p6), %v1450_v41, 7  ;;  %v1448_v43 = vld [vmem:[#allocation8] sm:$0xf] (!%p1611_p6) }
 0x161   : > { %2100 = vmatprep.subr.bf16.mxu1 %v2099_v54  ;;  %v791_v54 = vld [vmem:[%s2627_s27 + $0xf98] sm:$0xff]  ;;  %v2121_v57 = vpack.c.bf16 %v786_v51, %v782_v49 }
 0x162   : > { %v1456_v47 = vsub.s32 (!%p1611_p6), 1, %v1451_v42  ;;  %v1460_v48 = vsub.s32 (!%p1611_p6), 2, %v1451_v42  ;;  %v1464_v49 = vsub.s32 (!%p1611_p6), 3, %v1451_v42 }
 0x163   : > { %1846 = vmatpush1.bf16.msra.mxu0 %v1845_v60  ;;  %v792_v60 = vld [vmem:[%s2627_s27 + $0xfa0] sm:$0xff] }
 0x164   : > { %2102 = vmatpush1.bf16.msra.mxu1 %v2101_v61  ;;  %1848 = vmatprep.subr.bf16.mxu0 %v1847_v62  ;;  %v790_v61 = vld [vmem:[%s2627_s27 + $0xf90] sm:$0xff]  ;;  %v2123_v62 = vpack.c.bf16 %v795_v55, %v791_v54  ;;  %v1869_v4 = vpack.c.bf16 %v792_v60, %v788_v59  ;;  %v1457_v54 = vrot.slane (!%p1611_p6), %v1448_v43, %v1456_v47 }
 0x165   : > { %2104 = vmatprep.subr.bf16.mxu1 %v2103_v2  ;;  %v799_v2 = vld [vmem:[%s2627_s27 + $0xfd8] sm:$0xff]  ;;  %v2125_v5 = vpack.c.bf16 %v794_v63, %v790_v61  ;;  %v1461_v55 = vrot.slane (!%p1611_p6), %v1448_v43, %v1460_v48 }
 0x167   : > { %1850 = vmatpush1.bf16.msra.mxu0 %v1849_v8  ;;  %v800_v8 = vld [vmem:[%s2627_s27 + $0xfe0] sm:$0xff] }
 0x168   : > { %2106 = vmatpush1.bf16.msra.mxu1 %v2105_v9  ;;  %1852 = vmatprep.subr.bf16.mxu0 %v1851_v10  ;;  %v2127_v9 = vpack.c.bf16 %v803_v3, %v799_v2  ;;  %v798_v10 = vld [vmem:[%s2627_s27 + $0xfd0] sm:$0xff]  ;;  %v1873_v12 = vpack.c.bf16 %v800_v8, %v796_v7 }
 0x169   : > { %2108 = vmatprep.subr.bf16.mxu1 %v2107_v14  ;;  %v2129_v13 = vpack.c.bf16 %v802_v11, %v798_v10  ;;  %v282_v14 = vld [vmem:[%s2620_s24 + $0x30] sm:$0xff] }
 0x16b   : > { %1854 = vmatpush1.bf16.msra.mxu0 %v1853_v20 }
 0x16c   : > { %2110 = vmatpush1.bf16.msra.mxu1 %v2109_v21  ;;  %1856 = vmatprep.subr.bf16.mxu0 %v1855_v22  ;;  %v271_v21 = vld [vmem:[#allocation2 + $0x18] sm:$0xff] }
 0x16d   : > { %2112 = vmatprep.subr.bf16.mxu1 %v2111_v26 }
 0x16f   : > { %1858 = vmatpush1.bf16.msra.mxu0 %v1857_v32 }
 0x170   : > { %2114 = vmatpush1.bf16.msra.mxu1 %v2113_v33  ;;  %1860 = vmatprep.subr.bf16.mxu0 %v1859_v34  ;;  %v275_v33 = vld [vmem:[#allocation2 + $0x38] sm:$0xff] }
 0x171   : > { %2116 = vmatprep.subr.bf16.mxu1 %v2115_v38 }
 0x173   : > { %1862 = vmatpush1.bf16.msra.mxu0 %v1861_v44 }
 0x174   : > { %2118 = vmatpush1.bf16.msra.mxu1 %v2117_v45  ;;  %1864 = vmatprep.subr.bf16.mxu0 %v1863_v46  ;;  %v1452_v45 = vsub.s32 (!%p1611_p6), 0, %v1451_v42 }
 0x175   : > { %2120 = vmatprep.subr.bf16.mxu1 %v2119_v50 }
 0x176   : > { %v1453_v53 = vrot.slane (!%p1611_p6), %v1448_v43, %v1452_v45 }
 0x177   : > { %1866 = vmatpush1.bf16.msra.mxu0 %v1865_v56  ;;  %v1465_v56 = vrot.slane (!%p1611_p6), %v1448_v43, %v1464_v49 }
 0x178   : > { %2122 = vmatpush1.bf16.msra.mxu1 %v2121_v57  ;;  %1868 = vmatprep.subr.bf16.mxu0 %v1867_v58 }
 0x179   : > { %2124 = vmatprep.subr.bf16.mxu1 %v2123_v62 }
 0x17b   : > { %1870 = vmatpush1.bf16.msra.mxu0 %v1869_v4 }
 0x17c   : > { %2126 = vmatpush1.bf16.msra.mxu1 %v2125_v5  ;;  %1872 = vmatprep.subr.bf16.mxu0 %v1871_v6 }
 0x17d   : > { %2128 = vmatprep.subr.bf16.mxu1 %v2127_v9 }
 0x17f   : > { %1874 = vmatpush1.bf16.msra.mxu0 %v1873_v12 }
 0x180   : > { %2130 = vmatpush1.bf16.msra.mxu1 %v2129_v13 }
 0x182   : > { %1100 = vmatmul.mubr.f32.vlgmr.msra.gmra.mrb[0].mxu0 %v282_v14 }
 0x183   : > { %1408 = vmatmul.mubr.f32.vlgmr.msra.gmra.mrb[0].mxu1 %v282_v14  ;;  %1105 = vmatprep.mubr.f32.mxu0 %v291_v15 }
 0x184   : > { %1413 = vmatprep.mubr.f32.mxu1 %v291_v15 }
 0x186   : > { %1106 = vmatmul.mubr.f32.gmra.mrb[2].mxu0 %v290_v16 }
 0x187   : > { %1414 = vmatmul.mubr.f32.gmra.mrb[2].mxu1 %v290_v16 }
 0x255   : > { %v1101_v20 = vpop.f32.mrb[0].mxu0 }
 0x256   : > { %v1420_v22 = vadd.f32 %v1101_v20, %v268_v17  ;;  %v1409_v23 = vpop.f32.mrb[0].mxu1  ;;  %v1103_v24 = vpop.f32.mrb[1].mxu0 }
 0x257   : > { %v1422_v25 = vadd.f32 %v1409_v23, %v270_v18  ;;  %v1421_v26 = vadd.f32 %v1103_v24, %v269_v19  ;;  %v1411_v27 = vpop.f32.mrb[1].mxu1 }
 0x258   : > { %1428 = vst [vmem:[#allocation2] sm:$0xff] %v1420_v22  ;;  %v1423_v29 = vadd.f32 %v1411_v27, %v271_v21  ;;  %1439 = sbr.rel (%p1611_p6) target bundleno = 617 (0x269), region = 52 }
 0x259   : > { %1430 = vst [vmem:[#allocation2 + $0x10] sm:$0xff] %v1422_v25  ;;  %1429 = vst [vmem:[#allocation2 + $0x8] sm:$0xff] %v1421_v26  ;;  %v1107_v32 = vpop.f32.mrb[2].mxu0 }
 0x25a   : > { %1431 = vst [vmem:[#allocation2 + $0x18] sm:$0xff] %v1423_v29  ;;  %v1424_v34 = vadd.f32 %v1107_v32, %v272_v28  ;;  %v1415_v35 = vpop.f32.mrb[2].mxu1  ;;  %v1109_v36 = vpop.f32.mrb[3].mxu0 }
 0x25b   : > { %v1426_v37 = vadd.f32 %v1415_v35, %v274_v30  ;;  %v1425_v38 = vadd.f32 %v1109_v36, %v273_v31  ;;  %v1417_v39 = vpop.f32.mrb[3].mxu1 }
 0x25c   : > { %1432 = vst [vmem:[#allocation2 + $0x20] sm:$0xff] %v1424_v34  ;;  %v1427_v40 = vadd.f32 %v1417_v39, %v275_v33 }
 0x25d   : > { %1434 = vst [vmem:[#allocation2 + $0x30] sm:$0xff] %v1426_v37  ;;  %1433 = vst [vmem:[#allocation2 + $0x28] sm:$0xff] %v1425_v38 }
 0x25e   : > { %1435 = vst [vmem:[#allocation2 + $0x38] sm:$0xff] %v1427_v40 }
 0x25f   : > { %v1440_v44 = vld [vmem:[#allocation2] sm:$0xff] }
 0x260   : > { %v1441_v46 = vld [vmem:[#allocation2 + $0x8] sm:$0xff]  ;;  %v1442_v50 = vld [vmem:[#allocation2 + $0x10] sm:$0xff]  ;;  %v1470_v60 = vadd.f32 %v1453_v53, %v1440_v44 }
 0x261   : > { %v1443_v51 = vld [vmem:[#allocation2 + $0x18] sm:$0xff]  ;;  %v1471_v61 = vadd.f32 %v1457_v54, %v1441_v46  ;;  %v1472_v62 = vadd.f32 %v1461_v55, %v1442_v50 }
 0x262   : > { %v1473_v63 = vadd.f32 %v1465_v56, %v1443_v51  ;;  %1478 = vst [vmem:[#allocation9] sm:$0xff] %v1470_v60 }
 0x263   : > { %v1444_v52 = vld [vmem:[#allocation2 + $0x20] sm:$0xff]  ;;  %1479 = vst [vmem:[#allocation9 + $0x8] sm:$0xff] %v1471_v61  ;;  %1480 = vst [vmem:[#allocation9 + $0x10] sm:$0xff] %v1472_v62 }
 0x264   : > { %v1445_v57 = vld [vmem:[#allocation2 + $0x28] sm:$0xff]  ;;  %v1446_v58 = vld [vmem:[#allocation2 + $0x30] sm:$0xff]  ;;  %v1474_v0 = vadd.f32 %v1453_v53, %v1444_v52  ;;  %1481 = vst [vmem:[#allocation9 + $0x18] sm:$0xff] %v1473_v63 }
 0x265   : > { %v1447_v59 = vld [vmem:[#allocation2 + $0x38] sm:$0xff]  ;;  %v1475_v1 = vadd.f32 %v1457_v54, %v1445_v57  ;;  %v1476_v2 = vadd.f32 %v1461_v55, %v1446_v58 }
 0x266   : > { %v1477_v3 = vadd.f32 %v1465_v56, %v1447_v59  ;;  %1482 = vst [vmem:[#allocation9 + $0x20] sm:$0xff] %v1474_v0 }
 0x267   : > { %1483 = vst [vmem:[#allocation9 + $0x28] sm:$0xff] %v1475_v1  ;;  %1484 = vst [vmem:[#allocation9 + $0x30] sm:$0xff] %v1476_v2 }
 0x268   : > { %1485 = vst [vmem:[#allocation9 + $0x38] sm:$0xff] %v1477_v3 }
 0x269 PF: > { %p2181_p8 = scmp.eq.s32.totalorder %s2480_s18, 1  ;;  %s2428_s15 = smov [#allocation9]  }
 0x26a   : > { %s1496_s20 = sshll.u32 %s2428_s15, 4  ;;  %s1497_s20 = int_to_ptr.vmem [resolvable:$true] %s1496_s20 }
 0x26b   : > { %s2329_s21 = scalar_lea.vmem %s1497_s20, 1024  ;;  %p2336_p0 = scmp.lt.s32.totalorder %s1497_s20, %s1497_s20 }
 0x26c   : > { %p2330_p13 = scmp.ne.s32.totalorder %s1497_s20, %s2329_s21  ;;  %p2337_p5 = scmp.lt.s32.totalorder %s2329_s21, %s2329_s21 }
 0x26e   : > { %p2331_p1 = pnand %p2330_p13, %p2181_p8  ;;  %p2338_p7 = por %p2337_p5, %p2336_p0 }
 0x270   : > { %p2332_p2 = pneg %p2331_p1 }
 0x272   : > { %p2339_p9 = pnand %p2338_p7, %p2332_p2 }
 0x274   : > { %2342 = shalt.err (!%p2339_p9)
}
 0x275   : > { %s2343_s5 = scalar_lea.hbm %s3211_s3, 1024 }
 0x276   : > { %p2344_p12 = scmp.ne.s32.totalorder %s3211_s3, %s2343_s5  ;;  %p2349_p10 = scmp.lt.u32.totalorder %s2343_s5, %s3211_s3 }
 0x278   : > { %p2345_p4 = pnand %p2344_p12, %p2181_p8 }
 0x27a   : > { %p2346_p11 = pneg %p2345_p4 }
 0x27c   : > { %p2351_p3 = pnand %p2349_p10, %p2346_p11 }
 0x27e   : > { %2354 = shalt.err (!%p2351_p3)
}
 0x27f   : > { %s2429_s8 = smov 512   ;;  %s2430_s0 = smov 32  }
 0x280   : > { %2164 = dma.vmem_to_hbm [thread:$0]  (%p2181_p8), %s1497_s20, 1024, %s3211_s3, [#allocation5], %s2429_s8, %s2429_s8, %s2430_s0  }
 0x281   : > { %2392 = dma.done.wait (%p2181_p8), [#allocation5], 1024  }
 0x282   : > { %2394 = vsyncadd (%p2181_p8), [#allocation5], 4294966272 }
 0x283 PF: > { %s20_s17 = sadd.s32 1, %s2417_s17   ;;  %s3227_s12 = smov %s2401_s13 }
 0x284   : > { %p17_p6 = scmp.ge.s32.totalorder %s20_s17, 4   ;;  %s3228_s13 = smov %s2405_s14 }
 0x285   : > { %s3229_s14 = smov %s2550_s4  ;;  %s3230_s15 = smov %s2413_s16 }
 0x286   : > { %s3231_s16 = smov %s3233_s10  ;;  %19 = sbr.rel (!%p17_p6) target bundleno = 9 (0x9), region = 95 }
 0x28d   :  { %1512 = vsyncpa [#allocation4], 1 }
 0x28e   :  { %1514 = vsyncpa [#allocation4 + $0x1], 1 }
 0x28f   :  { %1515 = vsyncpa [#allocation7], 1 }
 0x290   :  { %1517 = vsyncpa [#allocation7 + $0x1], 1 }
 0x291   :  { %1518 = vsyncpa [#allocation5], 1 }
 0x292   :  { %1520 = vsyncpa [#allocation5 + $0x1], 1 }

</bundles_post_ra>
